<compile_context>
chip_gen: v7x
topology: tpu7x:2x2x1
jax: 0.10.0
libtpu: 0.0.40
codegen_flags: <defaults>
</compile_context>

<pallas_src>
import functools

import jax
import jax.numpy as jnp
from jax.experimental import pallas as pl
from jax.experimental.pallas import tpu as pltpu


LANE = 128


def _round_up(x, m):
    return (x + m - 1) // m * m


def _pick_tile(total, preferred):
    """Largest tile <= preferred that is a multiple of 8 and divides `total`,
    else the full extent (full extent is always a legal block size)."""
    if total <= preferred:
        return total
    t = (preferred // 8) * 8
    while t >= 8:
        if total % t == 0:
            return t
        t -= 8
    return total


def _largest_divisor_leq(n, cap):
    cap = max(1, min(n, cap))
    for d in range(cap, 0, -1):
        if n % d == 0:
            return d
    return 1


# ----------------------------------------------------------------------------
# Fused kernel: all layers + running max over the seq axis
# ----------------------------------------------------------------------------
def fused_extractor_kernel(*refs, num_layers, feat, eps, has_rest):
    if has_rest:
        (x_ref, w1f_ref, w1r_ref, w2_ref, b1_ref, b2_ref,
         g_ref, bt_ref, o_ref) = refs
    else:
        (x_ref, w1f_ref, w2_ref, b1_ref, b2_ref, g_ref, bt_ref, o_ref) = refs
        w1r_ref = None

    si = pl.program_id(1)                        # seq-tile index (reduction)
    tb, ts, p_in = x_ref.shape
    p_h = o_ref.shape[-1]
    rows = tb * ts
    inv_feat = 1.0 / float(feat)

    # Lane mask for padded feature lanes (hoisted once, only if padded).
    if p_h != feat:
        lane_mask = jax.lax.broadcasted_iota(jnp.int32, (1, p_h), 1) < feat

    # (TB, TS, P_in) -> (TB*TS, P_in): rows on sublanes, features on lanes.
    # x is already in the matmul dtype (bf16 or f32) -> fed to the MXU as-is.
    h = x_ref[...].reshape(rows, p_in)

    for l in range(num_layers):                  # small L -> fully unrolled
        w1 = w1f_ref[...] if l == 0 else w1r_ref[l - 1]
        w2 = w2_ref[l]

        h1 = jnp.dot(h.astype(w1.dtype), w1,
                     preferred_element_type=jnp.float32) + b1_ref[l]
        h1 = jnp.maximum(h1, 0.0)

        h2 = jnp.dot(h1.astype(w2.dtype), w2,
                     preferred_element_type=jnp.float32) + b2_ref[l]
        h2 = jnp.maximum(h2, 0.0)

        y = h2 + h1                               # residual on post-ReLU h1

        # Two-pass LayerNorm over the *unpadded* feature count. Padded lanes
        # of y are exactly 0 (see invariant at top), so sum(y) is correct;
        # padded lanes of (y - mean) are masked before the variance sum.
        mean = jnp.sum(y, axis=-1, keepdims=True) * inv_feat
        c = y - mean
        if p_h != feat:
            c = jnp.where(lane_mask, c, 0.0)
        var = jnp.sum(c * c, axis=-1, keepdims=True) * inv_feat
        inv_std = jax.lax.rsqrt(var + eps)
        # gamma/beta are zero-padded -> padded lanes of h stay exactly 0.
        h = c * inv_std * g_ref[l] + bt_ref[l]

    tile_max = jnp.max(h.reshape(tb, ts, p_h), axis=1, keepdims=True)

    @pl.when(si == 0)
    def _():                                      # first seq tile: write direct
        o_ref[...] = tile_max.astype(o_ref.dtype)

    @pl.when(si > 0)
    def _():                                      # later tiles: running max
        o_ref[...] = jnp.maximum(o_ref[...], tile_max.astype(o_ref.dtype))


# ----------------------------------------------------------------------------
# One-time parameter preparation (hoisted out of the per-call hot path)
# ----------------------------------------------------------------------------
def prepare_feature_extractor_params(params, *, matmul_dtype=jnp.bfloat16):
    f_in = params[0]["w1"].shape[0]
    hidden = params[0]["w1"].shape[1]
    num_layers = len(params)

    p_in = _round_up(max(f_in, 1), LANE)
    p_h = _round_up(hidden, LANE)

    def pad2(w, rows, cols):
        return jnp.pad(w, ((0, rows - w.shape[0]), (0, cols - w.shape[1])))

    def pad1(v, cols):
        return jnp.pad(v, (0, cols - v.shape[0]))

    prep = {
        "f_in": f_in, "hidden": hidden, "num_layers": num_layers,
        "p_in": p_in, "p_h": p_h, "matmul_dtype": jnp.dtype(matmul_dtype),
        "w1_first": pad2(params[0]["w1"], p_in, p_h).astype(matmul_dtype),
        "w2": jnp.stack([pad2(p["w2"], p_h, p_h) for p in params]
                        ).astype(matmul_dtype),
        "b1": jnp.stack([pad1(p["b1"], p_h) for p in params])[:, None, :]
              .astype(jnp.float32),
        "b2": jnp.stack([pad1(p["b2"], p_h) for p in params])[:, None, :]
              .astype(jnp.float32),
        "gamma": jnp.stack([pad1(p["gamma"], p_h) for p in params])[:, None, :]
                 .astype(jnp.float32),
        "beta": jnp.stack([pad1(p["beta"], p_h) for p in params])[:, None, :]
                .astype(jnp.float32),
    }
    if num_layers > 1:
        prep["w1_rest"] = jnp.stack(
            [pad2(p["w1"], p_h, p_h) for p in params[1:]]).astype(matmul_dtype)
    return prep


# ----------------------------------------------------------------------------
# Forward pass (hot path): pad/cast x, launch fused kernel
# ----------------------------------------------------------------------------
def feature_extractor_forward(prepared, x):
    """x: (batch, seq, input_size) -> (batch, hidden_size)."""
    b, s, f_in = x.shape
    assert f_in == prepared["f_in"], "input feature size mismatch"

    hidden = prepared["hidden"]
    num_layers = prepared["num_layers"]
    p_in, p_h = prepared["p_in"], prepared["p_h"]
    mm_dtype = prepared["matmul_dtype"]
    mm_bytes = mm_dtype.itemsize

    # Pad + cast x in one fused XLA pass (streamed in the matmul dtype, so bf16
    # halves x HBM traffic). Note: streaming x fully unpadded (block last dim
    # = f_in) would save this pass entirely; kept padded here for portable
    # lane-dense MXU K dims.
    if f_in != p_in or x.dtype != mm_dtype:
        xp = jnp.pad(x, ((0, 0), (0, 0), (0, p_in - f_in))).astype(mm_dtype)
    else:
        xp = x

    # --- generation-aware VMEM budget --------------------------------------
    try:
        phys_vmem = int(pltpu.get_tpu_info().vmem_capacity_bytes)
    except Exception:
        phys_vmem = 64 * 1024 * 1024
    vmem_limit = max(32 * 1024 * 1024, min(phys_vmem // 2, 96 * 1024 * 1024))

    weight_bytes = p_in * p_h * mm_bytes + num_layers * p_h * p_h * mm_bytes
    if num_layers > 1:
        weight_bytes += (num_layers - 1) * p_h * p_h * mm_bytes
    weight_bytes += 4 * num_layers * p_h * 4          # biases / gamma / beta

    # per-row VMEM: double-buffered x tile + ~8 live f32 (rows, p_h) temporaries
    per_row_bytes = 2 * p_in * mm_bytes + 8 * p_h * 4
    avail = vmem_limit - weight_bytes - (4 * 1024 * 1024)
    if avail < 8 * per_row_bytes:
        # TODO(synk): add a weight-chunked fallback (tile the p_h axis or layer
        # axis with an extra grid dim / emit_pipeline) when the resident
        # stacked weights exceed VMEM (e.g. hidden>=2048 bf16 L=4 on v7x).
        raise ValueError("stacked weights do not fit resident in VMEM; "
                         "weight-chunked fallback not implemented")
    rows_cap = max(8, min(4096, avail // per_row_bytes))

    # --- tiling -------------------------------------------------------------
    ts = _pick_tile(s, min(512, rows_cap))
    tb_budget = max(1, rows_cap // ts)
    if b >= 2:
        # guarantee >= 2 batch tiles so the "parallel" axis feeds both v7x TCs
        tb_budget = min(tb_budget, b // 2)
    tb = _largest_divisor_leq(b, tb_budget)
    grid = (b // tb, s // ts)

    # --- specs --------------------------------------------------------------
    def _const_spec(arr):
        nd = arr.ndim
        # Constant block index: fetched once, stays resident. Buffered(1)
        # avoids the default double-buffer (halves resident weight VMEM).
        return pl.BlockSpec(arr.shape, lambda bi, si, _nd=nd: (0,) * _nd,
                            pipeline_mode=pl.Buffered(1))

    weight_ops = [prepared["w1_first"]]
    if num_layers > 1:
        weight_ops.append(prepared["w1_rest"])
    weight_ops += [prepared["w2"], prepared["b1"], prepared["b2"],
                   prepared["gamma"], prepared["beta"]]

    in_specs = [pl.BlockSpec((tb, ts, p_in), lambda bi, si: (bi, si, 0))]
    in_specs += [_const_spec(w) for w in weight_ops]

    # 3-D output (b, 1, p_h): last two dims (1, p_h) are full-extent/128-aligned
    # so a batch tile of 1 remains a legal block; the running max lives in the
    # resident output block across the seq ("arbitrary") axis.
    out_specs = pl.BlockSpec((tb, 1, p_h), lambda bi, si: (bi, 0, 0))

    flops = 2 * b * s * (f_in * hidden + (2 * num_layers - 1) * hidden * hidden)
    bytes_accessed = (xp.size * mm_bytes
                      + sum(int(w.size) * w.dtype.itemsize for w in weight_ops)
                      + b * p_h * 4)
    cost = pl.CostEstimate(flops=int(flops),
                           transcendentals=int(b * s * num_layers),
                           bytes_accessed=int(bytes_accessed))

    kernel = functools.partial(fused_extractor_kernel,
                               num_layers=num_layers, feat=hidden, eps=1e-5,
                               has_rest=(num_layers > 1))

    out = pl.pallas_call(
        kernel,
        out_shape=jax.ShapeDtypeStruct((b, 1, p_h), jnp.float32),
        grid=grid,
        in_specs=in_specs,
        out_specs=out_specs,
        compiler_params=pltpu.CompilerParams(
            dimension_semantics=("parallel", "arbitrary"),
            vmem_limit_bytes=int(vmem_limit)),
        cost_estimate=cost,
    )(xp, *weight_ops)

    return out[:, 0, :hidden]


# ----------------------------------------------------------------------------
# Parameter init (mirrors the PyTorch __init__ shapes)
# ----------------------------------------------------------------------------
def init_layer_params(key, in_size, out_size):
    k1, k2 = jax.random.split(key)
    return {
        "w1": jax.random.normal(k1, (in_size, out_size), jnp.float32),
        "b1": jnp.zeros((out_size,), jnp.float32),
        "w2": jax.random.normal(k2, (out_size, out_size), jnp.float32),
        "b2": jnp.zeros((out_size,), jnp.float32),
        "gamma": jnp.ones((out_size,), jnp.float32),
        "beta": jnp.zeros((out_size,), jnp.float32),
    }


def init_feature_extractor(key, input_size, hidden_size, num_extractors):
    keys = jax.random.split(key, num_extractors)
    params = [init_layer_params(keys[0], input_size, hidden_size)]
    for i in range(1, num_extractors):
        params.append(init_layer_params(keys[i], hidden_size, hidden_size))
    return params


# pure-JAX reference for correctness checking
def reference_forward(params, x):
    h = x
    for p in params:
        a = jnp.maximum(h @ p["w1"] + p["b1"], 0.0)
        a2 = jnp.maximum(a @ p["w2"] + p["b2"], 0.0)
        y = a2 + a
        mean = jnp.mean(y, axis=-1, keepdims=True)
        var = jnp.mean((y - mean) ** 2, axis=-1, keepdims=True)
        h = (y - mean) / jnp.sqrt(var + 1e-5) * p["gamma"] + p["beta"]
    return jnp.max(h, axis=1)


if __name__ == "__main__":
    key = jax.random.PRNGKey(0)
    k_params, k_x = jax.random.split(key)

    batch, seq, input_size, hidden_size, num_extractors = 2, 8, 7, 32, 4
    params = init_feature_extractor(k_params, input_size, hidden_size,
                                    num_extractors)
    x = jax.random.normal(k_x, (batch, seq, input_size), jnp.float32)

    ref = reference_forward(params, x)

    # f32 MXU path (bit-faithful to the PyTorch module semantics)
    prep_f32 = prepare_feature_extractor_params(params,
                                                matmul_dtype=jnp.float32)
    out = jax.block_until_ready(feature_extractor_forward(prep_f32, x))
    assert out.shape == (batch, hidden_size)
    assert jnp.allclose(out, ref, atol=1e-4, rtol=1e-4), "mismatch vs reference"

    # bf16 MXU path (default / fast path on v5e..v7x) — loose check, since both
    # weights and matmul activations run in bf16.
    prep_bf16 = prepare_feature_extractor_params(params,
                                                 matmul_dtype=jnp.bfloat16)
    out_bf16 = jax.block_until_ready(feature_extractor_forward(prep_bf16, x))
    assert out_bf16.shape == (batch, hidden_size)
    assert bool(jnp.all(jnp.isfinite(out_bf16)))
    assert float(jnp.max(jnp.abs(out_bf16 - ref))) < 0.5

    print("KERNEL_OK")
</pallas_src>

<mosaic_0001>
module attributes {stable_mosaic.version = 11 : i64} {
  func.func @fused_extractor_kernel(%arg0: i32, %arg1: i32, %arg2: memref<1x8x128xf32, #tpu.memory_space<vmem>>, %arg3: memref<128x128xf32, #tpu.memory_space<vmem>>, %arg4: memref<3x128x128xf32, #tpu.memory_space<vmem>>, %arg5: memref<4x128x128xf32, #tpu.memory_space<vmem>>, %arg6: memref<4x1x128xf32, #tpu.memory_space<vmem>>, %arg7: memref<4x1x128xf32, #tpu.memory_space<vmem>>, %arg8: memref<4x1x128xf32, #tpu.memory_space<vmem>>, %arg9: memref<4x1x128xf32, #tpu.memory_space<vmem>>, %arg10: memref<1x1x128xf32, #tpu.memory_space<vmem>>) attributes {dimension_semantics = [#tpu.dimension_semantics<parallel>, #tpu.dimension_semantics<arbitrary>], iteration_bounds = array<i64: 2, 1>, scalar_prefetch = 0 : i64, scratch_operands = 0 : i64, tpu.core_type = #tpu.core_type<tc>, window_params = [{transform_indices = @transform_0, window_bounds = array<i64: 1, 8, 128>}, {pipeline_mode = #tpu.pipeline_mode<synchronous>, transform_indices = @transform_1, window_bounds = array<i64: 128, 128>}, {pipeline_mode = #tpu.pipeline_mode<synchronous>, transform_indices = @transform_2, window_bounds = array<i64: 3, 128, 128>}, {pipeline_mode = #tpu.pipeline_mode<synchronous>, transform_indices = @transform_3, window_bounds = array<i64: 4, 128, 128>}, {pipeline_mode = #tpu.pipeline_mode<synchronous>, transform_indices = @transform_4, window_bounds = array<i64: 4, 1, 128>}, {pipeline_mode = #tpu.pipeline_mode<synchronous>, transform_indices = @transform_5, window_bounds = array<i64: 4, 1, 128>}, {pipeline_mode = #tpu.pipeline_mode<synchronous>, transform_indices = @transform_6, window_bounds = array<i64: 4, 1, 128>}, {pipeline_mode = #tpu.pipeline_mode<synchronous>, transform_indices = @transform_7, window_bounds = array<i64: 4, 1, 128>}, {transform_indices = @transform_8, window_bounds = array<i64: 1, 1, 128>}]} {
    %0 = tpu.iota {dimensions = array<i32: 1>} : vector<1x128xi32>
    %c32_i32 = arith.constant 32 : i32
    %1 = vector.broadcast %c32_i32 : i32 to vector<1x128xi32>
    %2 = arith.cmpi slt, %0, %1 : vector<1x128xi32>
    %c0 = arith.constant 0 : index
    %c0_0 = arith.constant 0 : index
    %c0_1 = arith.constant 0 : index
    %3 = vector.load %arg2[%c0, %c0_0, %c0_1] : memref<1x8x128xf32, #tpu.memory_space<vmem>>, vector<1x8x128xf32>
    %4 = vector.shape_cast %3 : vector<1x8x128xf32> to vector<8x128xf32>
    %c0_2 = arith.constant 0 : index
    %c0_3 = arith.constant 0 : index
    %5 = vector.load %arg3[%c0_2, %c0_3] : memref<128x128xf32, #tpu.memory_space<vmem>>, vector<128x128xf32>
    %c0_4 = arith.constant 0 : index
    %c0_5 = arith.constant 0 : index
    %c0_6 = arith.constant 0 : index
    %6 = vector.load %arg5[%c0_4, %c0_5, %c0_6] : memref<4x128x128xf32, #tpu.memory_space<vmem>>, vector<1x128x128xf32>
    %7 = vector.shape_cast %6 : vector<1x128x128xf32> to vector<128x128xf32>
    %cst = arith.constant dense<0.000000e+00> : vector<8x128xf32>
    %8 = tpu.matmul %4, %5, %cst {dimension_numbers = #tpu.dot_dimension_numbers<[1], [0], [0], [1], [0, 0, 1, 1], [], []>} : vector<8x128xf32>, vector<128x128xf32>, vector<8x128xf32> -> vector<8x128xf32>
    %c0_7 = arith.constant 0 : index
    %c0_8 = arith.constant 0 : index
    %c0_9 = arith.constant 0 : index
    %9 = vector.load %arg6[%c0_7, %c0_8, %c0_9] : memref<4x1x128xf32, #tpu.memory_space<vmem>>, vector<1x1x128xf32>
    %10 = vector.shape_cast %9 : vector<1x1x128xf32> to vector<1x128xf32>
    %11 = vector.broadcast %10 : vector<1x128xf32> to vector<8x128xf32>
    %12 = arith.addf %8, %11 : vector<8x128xf32>
    %cst_10 = arith.constant 0.000000e+00 : f32
    %13 = vector.broadcast %cst_10 : f32 to vector<8x128xf32>
    %14 = arith.maximumf %12, %13 : vector<8x128xf32>
    %cst_11 = arith.constant dense<0.000000e+00> : vector<8x128xf32>
    %15 = tpu.matmul %14, %7, %cst_11 {dimension_numbers = #tpu.dot_dimension_numbers<[1], [0], [0], [1], [0, 0, 1, 1], [], []>} : vector<8x128xf32>, vector<128x128xf32>, vector<8x128xf32> -> vector<8x128xf32>
    %c0_12 = arith.constant 0 : index
    %c0_13 = arith.constant 0 : index
    %c0_14 = arith.constant 0 : index
    %16 = vector.load %arg7[%c0_12, %c0_13, %c0_14] : memref<4x1x128xf32, #tpu.memory_space<vmem>>, vector<1x1x128xf32>
    %17 = vector.shape_cast %16 : vector<1x1x128xf32> to vector<1x128xf32>
    %18 = vector.broadcast %17 : vector<1x128xf32> to vector<8x128xf32>
    %19 = arith.addf %15, %18 : vector<8x128xf32>
    %cst_15 = arith.constant 0.000000e+00 : f32
    %20 = vector.broadcast %cst_15 : f32 to vector<8x128xf32>
    %21 = arith.maximumf %19, %20 : vector<8x128xf32>
    %22 = arith.addf %21, %14 : vector<8x128xf32>
    %cst_16 = arith.constant dense<0.000000e+00> : vector<8xf32>
    %23 = vector.multi_reduction <add>, %22, %cst_16 [1] : vector<8x128xf32> to vector<8xf32>
    %24 = vector.shape_cast %23 : vector<8xf32> to vector<8x1xf32>
    %cst_17 = arith.constant 3.125000e-02 : f32
    %25 = vector.broadcast %cst_17 : f32 to vector<8x1xf32>
    %26 = arith.mulf %24, %25 : vector<8x1xf32>
    %27 = vector.broadcast %26 : vector<8x1xf32> to vector<8x128xf32>
    %28 = arith.subf %22, %27 : vector<8x128xf32>
    %cst_18 = arith.constant 0.000000e+00 : f32
    %29 = vector.shape_cast %2 : vector<1x128xi1> to vector<1x128xi1>
    %30 = vector.broadcast %29 : vector<1x128xi1> to vector<8x128xi1>
    %31 = vector.broadcast %cst_18 : f32 to vector<8x128xf32>
    %32 = arith.select %30, %28, %31 : vector<8x128xi1>, vector<8x128xf32>
    %33 = arith.mulf %32, %32 : vector<8x128xf32>
    %cst_19 = arith.constant dense<0.000000e+00> : vector<8xf32>
    %34 = vector.multi_reduction <add>, %33, %cst_19 [1] : vector<8x128xf32> to vector<8xf32>
    %35 = vector.shape_cast %34 : vector<8xf32> to vector<8x1xf32>
    %cst_20 = arith.constant 3.125000e-02 : f32
    %36 = vector.broadcast %cst_20 : f32 to vector<8x1xf32>
    %37 = arith.mulf %35, %36 : vector<8x1xf32>
    %cst_21 = arith.constant 9.99999974E-6 : f32
    %38 = vector.broadcast %cst_21 : f32 to vector<8x1xf32>
    %39 = arith.addf %37, %38 : vector<8x1xf32>
    %40 = math.rsqrt %39 : vector<8x1xf32>
    %41 = vector.broadcast %40 : vector<8x1xf32> to vector<8x128xf32>
    %42 = arith.mulf %32, %41 : vector<8x128xf32>
    %c0_22 = arith.constant 0 : index
    %c0_23 = arith.constant 0 : index
    %c0_24 = arith.constant 0 : index
    %43 = vector.load %arg8[%c0_22, %c0_23, %c0_24] : memref<4x1x128xf32, #tpu.memory_space<vmem>>, vector<1x1x128xf32>
    %44 = vector.shape_cast %43 : vector<1x1x128xf32> to vector<1x128xf32>
    %45 = vector.broadcast %44 : vector<1x128xf32> to vector<8x128xf32>
    %46 = arith.mulf %42, %45 : vector<8x128xf32>
    %c0_25 = arith.constant 0 : index
    %c0_26 = arith.constant 0 : index
    %c0_27 = arith.constant 0 : index
    %47 = vector.load %arg9[%c0_25, %c0_26, %c0_27] : memref<4x1x128xf32, #tpu.memory_space<vmem>>, vector<1x1x128xf32>
    %48 = vector.shape_cast %47 : vector<1x1x128xf32> to vector<1x128xf32>
    %49 = vector.broadcast %48 : vector<1x128xf32> to vector<8x128xf32>
    %50 = arith.addf %46, %49 : vector<8x128xf32>
    %c0_28 = arith.constant 0 : index
    %c0_29 = arith.constant 0 : index
    %c0_30 = arith.constant 0 : index
    %51 = vector.load %arg4[%c0_28, %c0_29, %c0_30] : memref<3x128x128xf32, #tpu.memory_space<vmem>>, vector<1x128x128xf32>
    %52 = vector.shape_cast %51 : vector<1x128x128xf32> to vector<128x128xf32>
    %c1 = arith.constant 1 : index
    %c0_31 = arith.constant 0 : index
    %c0_32 = arith.constant 0 : index
    %53 = vector.load %arg5[%c1, %c0_31, %c0_32] : memref<4x128x128xf32, #tpu.memory_space<vmem>>, vector<1x128x128xf32>
    %54 = vector.shape_cast %53 : vector<1x128x128xf32> to vector<128x128xf32>
    %cst_33 = arith.constant dense<0.000000e+00> : vector<8x128xf32>
    %55 = tpu.matmul %50, %52, %cst_33 {dimension_numbers = #tpu.dot_dimension_numbers<[1], [0], [0], [1], [0, 0, 1, 1], [], []>} : vector<8x128xf32>, vector<128x128xf32>, vector<8x128xf32> -> vector<8x128xf32>
    %c1_34 = arith.constant 1 : index
    %c0_35 = arith.constant 0 : index
    %c0_36 = arith.constant 0 : index
    %56 = vector.load %arg6[%c1_34, %c0_35, %c0_36] : memref<4x1x128xf32, #tpu.memory_space<vmem>>, vector<1x1x128xf32>
    %57 = vector.shape_cast %56 : vector<1x1x128xf32> to vector<1x128xf32>
    %58 = vector.broadcast %57 : vector<1x128xf32> to vector<8x128xf32>
    %59 = arith.addf %55, %58 : vector<8x128xf32>
    %cst_37 = arith.constant 0.000000e+00 : f32
    %60 = vector.broadcast %cst_37 : f32 to vector<8x128xf32>
    %61 = arith.maximumf %59, %60 : vector<8x128xf32>
    %cst_38 = arith.constant dense<0.000000e+00> : vector<8x128xf32>
    %62 = tpu.matmul %61, %54, %cst_38 {dimension_numbers = #tpu.dot_dimension_numbers<[1], [0], [0], [1], [0, 0, 1, 1], [], []>} : vector<8x128xf32>, vector<128x128xf32>, vector<8x128xf32> -> vector<8x128xf32>
    %c1_39 = arith.constant 1 : index
    %c0_40 = arith.constant 0 : index
    %c0_41 = arith.constant 0 : index
    %63 = vector.load %arg7[%c1_39, %c0_40, %c0_41] : memref<4x1x128xf32, #tpu.memory_space<vmem>>, vector<1x1x128xf32>
    %64 = vector.shape_cast %63 : vector<1x1x128xf32> to vector<1x128xf32>
    %65 = vector.broadcast %64 : vector<1x128xf32> to vector<8x128xf32>
    %66 = arith.addf %62, %65 : vector<8x128xf32>
    %cst_42 = arith.constant 0.000000e+00 : f32
    %67 = vector.broadcast %cst_42 : f32 to vector<8x128xf32>
    %68 = arith.maximumf %66, %67 : vector<8x128xf32>
    %69 = arith.addf %68, %61 : vector<8x128xf32>
    %cst_43 = arith.constant dense<0.000000e+00> : vector<8xf32>
    %70 = vector.multi_reduction <add>, %69, %cst_43 [1] : vector<8x128xf32> to vector<8xf32>
    %71 = vector.shape_cast %70 : vector<8xf32> to vector<8x1xf32>
    %cst_44 = arith.constant 3.125000e-02 : f32
    %72 = vector.broadcast %cst_44 : f32 to vector<8x1xf32>
    %73 = arith.mulf %71, %72 : vector<8x1xf32>
    %74 = vector.broadcast %73 : vector<8x1xf32> to vector<8x128xf32>
    %75 = arith.subf %69, %74 : vector<8x128xf32>
    %cst_45 = arith.constant 0.000000e+00 : f32
    %76 = vector.shape_cast %2 : vector<1x128xi1> to vector<1x128xi1>
    %77 = vector.broadcast %76 : vector<1x128xi1> to vector<8x128xi1>
    %78 = vector.broadcast %cst_45 : f32 to vector<8x128xf32>
    %79 = arith.select %77, %75, %78 : vector<8x128xi1>, vector<8x128xf32>
    %80 = arith.mulf %79, %79 : vector<8x128xf32>
    %cst_46 = arith.constant dense<0.000000e+00> : vector<8xf32>
    %81 = vector.multi_reduction <add>, %80, %cst_46 [1] : vector<8x128xf32> to vector<8xf32>
    %82 = vector.shape_cast %81 : vector<8xf32> to vector<8x1xf32>
    %cst_47 = arith.constant 3.125000e-02 : f32
    %83 = vector.broadcast %cst_47 : f32 to vector<8x1xf32>
    %84 = arith.mulf %82, %83 : vector<8x1xf32>
    %cst_48 = arith.constant 9.99999974E-6 : f32
    %85 = vector.broadcast %cst_48 : f32 to vector<8x1xf32>
    %86 = arith.addf %84, %85 : vector<8x1xf32>
    %87 = math.rsqrt %86 : vector<8x1xf32>
    %88 = vector.broadcast %87 : vector<8x1xf32> to vector<8x128xf32>
    %89 = arith.mulf %79, %88 : vector<8x128xf32>
    %c1_49 = arith.constant 1 : index
    %c0_50 = arith.constant 0 : index
    %c0_51 = arith.constant 0 : index
    %90 = vector.load %arg8[%c1_49, %c0_50, %c0_51] : memref<4x1x128xf32, #tpu.memory_space<vmem>>, vector<1x1x128xf32>
    %91 = vector.shape_cast %90 : vector<1x1x128xf32> to vector<1x128xf32>
    %92 = vector.broadcast %91 : vector<1x128xf32> to vector<8x128xf32>
    %93 = arith.mulf %89, %92 : vector<8x128xf32>
    %c1_52 = arith.constant 1 : index
    %c0_53 = arith.constant 0 : index
    %c0_54 = arith.constant 0 : index
    %94 = vector.load %arg9[%c1_52, %c0_53, %c0_54] : memref<4x1x128xf32, #tpu.memory_space<vmem>>, vector<1x1x128xf32>
    %95 = vector.shape_cast %94 : vector<1x1x128xf32> to vector<1x128xf32>
    %96 = vector.broadcast %95 : vector<1x128xf32> to vector<8x128xf32>
    %97 = arith.addf %93, %96 : vector<8x128xf32>
    %c1_55 = arith.constant 1 : index
    %c0_56 = arith.constant 0 : index
    %c0_57 = arith.constant 0 : index
    %98 = vector.load %arg4[%c1_55, %c0_56, %c0_57] : memref<3x128x128xf32, #tpu.memory_space<vmem>>, vector<1x128x128xf32>
    %99 = vector.shape_cast %98 : vector<1x128x128xf32> to vector<128x128xf32>
    %c2 = arith.constant 2 : index
    %c0_58 = arith.constant 0 : index
    %c0_59 = arith.constant 0 : index
    %100 = vector.load %arg5[%c2, %c0_58, %c0_59] : memref<4x128x128xf32, #tpu.memory_space<vmem>>, vector<1x128x128xf32>
    %101 = vector.shape_cast %100 : vector<1x128x128xf32> to vector<128x128xf32>
    %cst_60 = arith.constant dense<0.000000e+00> : vector<8x128xf32>
    %102 = tpu.matmul %97, %99, %cst_60 {dimension_numbers = #tpu.dot_dimension_numbers<[1], [0], [0], [1], [0, 0, 1, 1], [], []>} : vector<8x128xf32>, vector<128x128xf32>, vector<8x128xf32> -> vector<8x128xf32>
    %c2_61 = arith.constant 2 : index
    %c0_62 = arith.constant 0 : index
    %c0_63 = arith.constant 0 : index
    %103 = vector.load %arg6[%c2_61, %c0_62, %c0_63] : memref<4x1x128xf32, #tpu.memory_space<vmem>>, vector<1x1x128xf32>
    %104 = vector.shape_cast %103 : vector<1x1x128xf32> to vector<1x128xf32>
    %105 = vector.broadcast %104 : vector<1x128xf32> to vector<8x128xf32>
    %106 = arith.addf %102, %105 : vector<8x128xf32>
    %cst_64 = arith.constant 0.000000e+00 : f32
    %107 = vector.broadcast %cst_64 : f32 to vector<8x128xf32>
    %108 = arith.maximumf %106, %107 : vector<8x128xf32>
    %cst_65 = arith.constant dense<0.000000e+00> : vector<8x128xf32>
    %109 = tpu.matmul %108, %101, %cst_65 {dimension_numbers = #tpu.dot_dimension_numbers<[1], [0], [0], [1], [0, 0, 1, 1], [], []>} : vector<8x128xf32>, vector<128x128xf32>, vector<8x128xf32> -> vector<8x128xf32>
    %c2_66 = arith.constant 2 : index
    %c0_67 = arith.constant 0 : index
    %c0_68 = arith.constant 0 : index
    %110 = vector.load %arg7[%c2_66, %c0_67, %c0_68] : memref<4x1x128xf32, #tpu.memory_space<vmem>>, vector<1x1x128xf32>
    %111 = vector.shape_cast %110 : vector<1x1x128xf32> to vector<1x128xf32>
    %112 = vector.broadcast %111 : vector<1x128xf32> to vector<8x128xf32>
    %113 = arith.addf %109, %112 : vector<8x128xf32>
    %cst_69 = arith.constant 0.000000e+00 : f32
    %114 = vector.broadcast %cst_69 : f32 to vector<8x128xf32>
    %115 = arith.maximumf %113, %114 : vector<8x128xf32>
    %116 = arith.addf %115, %108 : vector<8x128xf32>
    %cst_70 = arith.constant dense<0.000000e+00> : vector<8xf32>
    %117 = vector.multi_reduction <add>, %116, %cst_70 [1] : vector<8x128xf32> to vector<8xf32>
    %118 = vector.shape_cast %117 : vector<8xf32> to vector<8x1xf32>
    %cst_71 = arith.constant 3.125000e-02 : f32
    %119 = vector.broadcast %cst_71 : f32 to vector<8x1xf32>
    %120 = arith.mulf %118, %119 : vector<8x1xf32>
    %121 = vector.broadcast %120 : vector<8x1xf32> to vector<8x128xf32>
    %122 = arith.subf %116, %121 : vector<8x128xf32>
    %cst_72 = arith.constant 0.000000e+00 : f32
    %123 = vector.shape_cast %2 : vector<1x128xi1> to vector<1x128xi1>
    %124 = vector.broadcast %123 : vector<1x128xi1> to vector<8x128xi1>
    %125 = vector.broadcast %cst_72 : f32 to vector<8x128xf32>
    %126 = arith.select %124, %122, %125 : vector<8x128xi1>, vector<8x128xf32>
    %127 = arith.mulf %126, %126 : vector<8x128xf32>
    %cst_73 = arith.constant dense<0.000000e+00> : vector<8xf32>
    %128 = vector.multi_reduction <add>, %127, %cst_73 [1] : vector<8x128xf32> to vector<8xf32>
    %129 = vector.shape_cast %128 : vector<8xf32> to vector<8x1xf32>
    %cst_74 = arith.constant 3.125000e-02 : f32
    %130 = vector.broadcast %cst_74 : f32 to vector<8x1xf32>
    %131 = arith.mulf %129, %130 : vector<8x1xf32>
    %cst_75 = arith.constant 9.99999974E-6 : f32
    %132 = vector.broadcast %cst_75 : f32 to vector<8x1xf32>
    %133 = arith.addf %131, %132 : vector<8x1xf32>
    %134 = math.rsqrt %133 : vector<8x1xf32>
    %135 = vector.broadcast %134 : vector<8x1xf32> to vector<8x128xf32>
    %136 = arith.mulf %126, %135 : vector<8x128xf32>
    %c2_76 = arith.constant 2 : index
    %c0_77 = arith.constant 0 : index
    %c0_78 = arith.constant 0 : index
    %137 = vector.load %arg8[%c2_76, %c0_77, %c0_78] : memref<4x1x128xf32, #tpu.memory_space<vmem>>, vector<1x1x128xf32>
    %138 = vector.shape_cast %137 : vector<1x1x128xf32> to vector<1x128xf32>
    %139 = vector.broadcast %138 : vector<1x128xf32> to vector<8x128xf32>
    %140 = arith.mulf %136, %139 : vector<8x128xf32>
    %c2_79 = arith.constant 2 : index
    %c0_80 = arith.constant 0 : index
    %c0_81 = arith.constant 0 : index
    %141 = vector.load %arg9[%c2_79, %c0_80, %c0_81] : memref<4x1x128xf32, #tpu.memory_space<vmem>>, vector<1x1x128xf32>
    %142 = vector.shape_cast %141 : vector<1x1x128xf32> to vector<1x128xf32>
    %143 = vector.broadcast %142 : vector<1x128xf32> to vector<8x128xf32>
    %144 = arith.addf %140, %143 : vector<8x128xf32>
    %c2_82 = arith.constant 2 : index
    %c0_83 = arith.constant 0 : index
    %c0_84 = arith.constant 0 : index
    %145 = vector.load %arg4[%c2_82, %c0_83, %c0_84] : memref<3x128x128xf32, #tpu.memory_space<vmem>>, vector<1x128x128xf32>
    %146 = vector.shape_cast %145 : vector<1x128x128xf32> to vector<128x128xf32>
    %c3 = arith.constant 3 : index
    %c0_85 = arith.constant 0 : index
    %c0_86 = arith.constant 0 : index
    %147 = vector.load %arg5[%c3, %c0_85, %c0_86] : memref<4x128x128xf32, #tpu.memory_space<vmem>>, vector<1x128x128xf32>
    %148 = vector.shape_cast %147 : vector<1x128x128xf32> to vector<128x128xf32>
    %cst_87 = arith.constant dense<0.000000e+00> : vector<8x128xf32>
    %149 = tpu.matmul %144, %146, %cst_87 {dimension_numbers = #tpu.dot_dimension_numbers<[1], [0], [0], [1], [0, 0, 1, 1], [], []>} : vector<8x128xf32>, vector<128x128xf32>, vector<8x128xf32> -> vector<8x128xf32>
    %c3_88 = arith.constant 3 : index
    %c0_89 = arith.constant 0 : index
    %c0_90 = arith.constant 0 : index
    %150 = vector.load %arg6[%c3_88, %c0_89, %c0_90] : memref<4x1x128xf32, #tpu.memory_space<vmem>>, vector<1x1x128xf32>
    %151 = vector.shape_cast %150 : vector<1x1x128xf32> to vector<1x128xf32>
    %152 = vector.broadcast %151 : vector<1x128xf32> to vector<8x128xf32>
    %153 = arith.addf %149, %152 : vector<8x128xf32>
    %cst_91 = arith.constant 0.000000e+00 : f32
    %154 = vector.broadcast %cst_91 : f32 to vector<8x128xf32>
    %155 = arith.maximumf %153, %154 : vector<8x128xf32>
    %cst_92 = arith.constant dense<0.000000e+00> : vector<8x128xf32>
    %156 = tpu.matmul %155, %148, %cst_92 {dimension_numbers = #tpu.dot_dimension_numbers<[1], [0], [0], [1], [0, 0, 1, 1], [], []>} : vector<8x128xf32>, vector<128x128xf32>, vector<8x128xf32> -> vector<8x128xf32>
    %c3_93 = arith.constant 3 : index
    %c0_94 = arith.constant 0 : index
    %c0_95 = arith.constant 0 : index
    %157 = vector.load %arg7[%c3_93, %c0_94, %c0_95] : memref<4x1x128xf32, #tpu.memory_space<vmem>>, vector<1x1x128xf32>
    %158 = vector.shape_cast %157 : vector<1x1x128xf32> to vector<1x128xf32>
    %159 = vector.broadcast %158 : vector<1x128xf32> to vector<8x128xf32>
    %160 = arith.addf %156, %159 : vector<8x128xf32>
    %cst_96 = arith.constant 0.000000e+00 : f32
    %161 = vector.broadcast %cst_96 : f32 to vector<8x128xf32>
    %162 = arith.maximumf %160, %161 : vector<8x128xf32>
    %163 = arith.addf %162, %155 : vector<8x128xf32>
    %cst_97 = arith.constant dense<0.000000e+00> : vector<8xf32>
    %164 = vector.multi_reduction <add>, %163, %cst_97 [1] : vector<8x128xf32> to vector<8xf32>
    %165 = vector.shape_cast %164 : vector<8xf32> to vector<8x1xf32>
    %cst_98 = arith.constant 3.125000e-02 : f32
    %166 = vector.broadcast %cst_98 : f32 to vector<8x1xf32>
    %167 = arith.mulf %165, %166 : vector<8x1xf32>
    %168 = vector.broadcast %167 : vector<8x1xf32> to vector<8x128xf32>
    %169 = arith.subf %163, %168 : vector<8x128xf32>
    %cst_99 = arith.constant 0.000000e+00 : f32
    %170 = vector.shape_cast %2 : vector<1x128xi1> to vector<1x128xi1>
    %171 = vector.broadcast %170 : vector<1x128xi1> to vector<8x128xi1>
    %172 = vector.broadcast %cst_99 : f32 to vector<8x128xf32>
    %173 = arith.select %171, %169, %172 : vector<8x128xi1>, vector<8x128xf32>
    %174 = arith.mulf %173, %173 : vector<8x128xf32>
    %cst_100 = arith.constant dense<0.000000e+00> : vector<8xf32>
    %175 = vector.multi_reduction <add>, %174, %cst_100 [1] : vector<8x128xf32> to vector<8xf32>
    %176 = vector.shape_cast %175 : vector<8xf32> to vector<8x1xf32>
    %cst_101 = arith.constant 3.125000e-02 : f32
    %177 = vector.broadcast %cst_101 : f32 to vector<8x1xf32>
    %178 = arith.mulf %176, %177 : vector<8x1xf32>
    %cst_102 = arith.constant 9.99999974E-6 : f32
    %179 = vector.broadcast %cst_102 : f32 to vector<8x1xf32>
    %180 = arith.addf %178, %179 : vector<8x1xf32>
    %181 = math.rsqrt %180 : vector<8x1xf32>
    %182 = vector.broadcast %181 : vector<8x1xf32> to vector<8x128xf32>
    %183 = arith.mulf %173, %182 : vector<8x128xf32>
    %c3_103 = arith.constant 3 : index
    %c0_104 = arith.constant 0 : index
    %c0_105 = arith.constant 0 : index
    %184 = vector.load %arg8[%c3_103, %c0_104, %c0_105] : memref<4x1x128xf32, #tpu.memory_space<vmem>>, vector<1x1x128xf32>
    %185 = vector.shape_cast %184 : vector<1x1x128xf32> to vector<1x128xf32>
    %186 = vector.broadcast %185 : vector<1x128xf32> to vector<8x128xf32>
    %187 = arith.mulf %183, %186 : vector<8x128xf32>
    %c3_106 = arith.constant 3 : index
    %c0_107 = arith.constant 0 : index
    %c0_108 = arith.constant 0 : index
    %188 = vector.load %arg9[%c3_106, %c0_107, %c0_108] : memref<4x1x128xf32, #tpu.memory_space<vmem>>, vector<1x1x128xf32>
    %189 = vector.shape_cast %188 : vector<1x1x128xf32> to vector<1x128xf32>
    %190 = vector.broadcast %189 : vector<1x128xf32> to vector<8x128xf32>
    %191 = arith.addf %187, %190 : vector<8x128xf32>
    %192 = vector.shape_cast %191 : vector<8x128xf32> to vector<1x8x128xf32>
    %cst_109 = arith.constant dense<0xFF800000> : vector<1x128xf32>
    %193 = vector.multi_reduction <maximumf>, %192, %cst_109 [1] : vector<1x8x128xf32> to vector<1x128xf32>
    %194 = vector.shape_cast %193 : vector<1x128xf32> to vector<1x1x128xf32>
    %c0_i32 = arith.constant 0 : i32
    %195 = arith.cmpi eq, %arg1, %c0_i32 : i32
    %196 = arith.extui %195 : i1 to i32
    %c0_i32_110 = arith.constant 0 : i32
    %197 = arith.cmpi ne, %196, %c0_i32_110 : i32
    scf.if %197 {
      %c0_113 = arith.constant 0 : index
      %c0_114 = arith.constant 0 : index
      %c0_115 = arith.constant 0 : index
      %201 = vector.load %arg10[%c0_113, %c0_114, %c0_115] : memref<1x1x128xf32, #tpu.memory_space<vmem>>, vector<1x1x128xf32>
      tpu.vector_store %arg10[%c0_113, %c0_114, %c0_115], %194 {strides = array<i32>} : memref<1x1x128xf32, #tpu.memory_space<vmem>>, vector<1x1x128xf32>,
    } else {
    }
    %c0_i32_111 = arith.constant 0 : i32
    %198 = arith.cmpi sgt, %arg1, %c0_i32_111 : i32
    %199 = arith.extui %198 : i1 to i32
    %c0_i32_112 = arith.constant 0 : i32
    %200 = arith.cmpi ne, %199, %c0_i32_112 : i32
    scf.if %200 {
      %c0_113 = arith.constant 0 : index
      %c0_114 = arith.constant 0 : index
      %c0_115 = arith.constant 0 : index
      %201 = vector.load %arg10[%c0_113, %c0_114, %c0_115] : memref<1x1x128xf32, #tpu.memory_space<vmem>>, vector<1x1x128xf32>
      %202 = arith.maximumf %201, %194 : vector<1x1x128xf32>
      %c0_116 = arith.constant 0 : index
      %c0_117 = arith.constant 0 : index
      %c0_118 = arith.constant 0 : index
      %203 = vector.load %arg10[%c0_116, %c0_117, %c0_118] : memref<1x1x128xf32, #tpu.memory_space<vmem>>, vector<1x1x128xf32>
      tpu.vector_store %arg10[%c0_116, %c0_117, %c0_118], %202 {strides = array<i32>} : memref<1x1x128xf32, #tpu.memory_space<vmem>>, vector<1x1x128xf32>,
    } else {
    }
    return
  }
  func.func @transform_0(%arg0: i32, %arg1: i32) -> (i32, i32, i32) {
    %c0_i32 = arith.constant 0 : i32
    %c0_i32_0 = arith.constant 0 : i32
    return %arg0, %arg1, %c0_i32 : i32, i32, i32
  }
  func.func @transform_1(%arg0: i32, %arg1: i32) -> (i32, i32) {
    %c0_i32 = arith.constant 0 : i32
    %c0_i32_0 = arith.constant 0 : i32
    %c0_i32_1 = arith.constant 0 : i32
    return %c0_i32, %c0_i32_0 : i32, i32
  }
  func.func @transform_2(%arg0: i32, %arg1: i32) -> (i32, i32, i32) {
    %c0_i32 = arith.constant 0 : i32
    %c0_i32_0 = arith.constant 0 : i32
    %c0_i32_1 = arith.constant 0 : i32
    %c0_i32_2 = arith.constant 0 : i32
    return %c0_i32, %c0_i32_0, %c0_i32_1 : i32, i32, i32
  }
  func.func @transform_3(%arg0: i32, %arg1: i32) -> (i32, i32, i32) {
    %c0_i32 = arith.constant 0 : i32
    %c0_i32_0 = arith.constant 0 : i32
    %c0_i32_1 = arith.constant 0 : i32
    %c0_i32_2 = arith.constant 0 : i32
    return %c0_i32, %c0_i32_0, %c0_i32_1 : i32, i32, i32
  }
  func.func @transform_4(%arg0: i32, %arg1: i32) -> (i32, i32, i32) {
    %c0_i32 = arith.constant 0 : i32
    %c0_i32_0 = arith.constant 0 : i32
    %c0_i32_1 = arith.constant 0 : i32
    %c0_i32_2 = arith.constant 0 : i32
    return %c0_i32, %c0_i32_0, %c0_i32_1 : i32, i32, i32
  }
  func.func @transform_5(%arg0: i32, %arg1: i32) -> (i32, i32, i32) {
    %c0_i32 = arith.constant 0 : i32
    %c0_i32_0 = arith.constant 0 : i32
    %c0_i32_1 = arith.constant 0 : i32
    %c0_i32_2 = arith.constant 0 : i32
    return %c0_i32, %c0_i32_0, %c0_i32_1 : i32, i32, i32
  }
  func.func @transform_6(%arg0: i32, %arg1: i32) -> (i32, i32, i32) {
    %c0_i32 = arith.constant 0 : i32
    %c0_i32_0 = arith.constant 0 : i32
    %c0_i32_1 = arith.constant 0 : i32
    %c0_i32_2 = arith.constant 0 : i32
    return %c0_i32, %c0_i32_0, %c0_i32_1 : i32, i32, i32
  }
  func.func @transform_7(%arg0: i32, %arg1: i32) -> (i32, i32, i32) {
    %c0_i32 = arith.constant 0 : i32
    %c0_i32_0 = arith.constant 0 : i32
    %c0_i32_1 = arith.constant 0 : i32
    %c0_i32_2 = arith.constant 0 : i32
    return %c0_i32, %c0_i32_0, %c0_i32_1 : i32, i32, i32
  }
  func.func @transform_8(%arg0: i32, %arg1: i32) -> (i32, i32, i32) {
    %c0_i32 = arith.constant 0 : i32
    %c0_i32_0 = arith.constant 0 : i32
    %c0_i32_1 = arith.constant 0 : i32
    return %arg0, %c0_i32, %c0_i32_0 : i32, i32, i32
  }
}

</mosaic_0001>

<bundles_post_ra>
// kernel: tpu_custom_call.1
= control target key start
LH: loop header
LB: loop body
LE: loop exit
PB: predicated region body
PF: predicated region fallthrough
CT: control target
= control target key end

     0   :  { %s2867_s0 = inlined_call_operand.hbm [shape: f32[2,8,128], index: 0, kind: input, shape index: {}]   ;;  %s2868_s1 = inlined_call_operand.hbm [shape: f32[128,128], index: 1, kind: input, shape index: {}]   ;;  %s2869_s2 = inlined_call_operand.hbm [shape: f32[3,128,128], index: 2, kind: input, shape index: {}]   ;;  %s2870_s3 = inlined_call_operand.hbm [shape: f32[4,128,128], index: 3, kind: input, shape index: {}]   ;;  %s2871_s4 = inlined_call_operand.vmem [shape: f32[4,1,128], index: 4, kind: input, shape index: {}]   ;;  %s2872_s5 = inlined_call_operand.vmem [shape: f32[4,1,128], index: 5, kind: input, shape index: {}]   ;;  %s2873_s6 = inlined_call_operand.vmem [shape: f32[4,1,128], index: 6, kind: input, shape index: {}]   ;;  %s2874_s7 = inlined_call_operand.vmem [shape: f32[4,1,128], index: 7, kind: input, shape index: {}]   ;;  %s2875_s8 = inlined_call_operand.hbm [shape: f32[2,1,128], index: 8, kind: output, shape index: {}]  }
   0x1   :  { %2884 = sst [smem:[#allocation18_spill]] %s2874_s7 }
   0x2   :  { %2885 = sst [smem:[#allocation19_spill]] %s2875_s8 }
   0x3   :  { %13 = vsyncpa [#allocation3], 0 }
   0x4   :  { %15 = vsyncpa [#allocation3 + $0x1], 0 }
   0x5   :  { %16 = vsyncpa [#allocation6], 0 }
   0x6   :  { %17 = vsyncpa [#allocation9], 0 }
   0x7   :  { %18 = vsyncpa [#allocation4], 0 }
   0x8   :  { %20 = vsyncpa [#allocation4 + $0x1], 0  ;;  %s2425_s27 = smov 0   ;;  %s2427_s28 = smov 0  }
   0x9   :  { %s2429_s29 = smov 0   ;;  %s2431_s30 = smov 0  }
   0xa   :  { %s2433_s9 = smov 0   ;;  %s2435_s10 = smov 0  }
   0xb LB: > { %2886 = sst [smem:[#allocation15_spill]] %s2348_s27  ;;  %s1405_s11 = sadd.s32 4294967295, %s2368_s10   ;;  %s2368_s10 = sphi %s2435_s10, %s26_s10   ;;  %s2364_s9 = sphi %s2433_s9, %s2914_s9   ;;  %s2360_s30 = sphi %s2431_s30, %s2913_s30   ;;  %s2356_s29 = sphi %s2429_s29, %s2912_s29   ;;  %s2352_s28 = sphi %s2427_s28, %s2911_s28   ;;  %s2348_s27 = sphi %s2425_s27, %s2910_s27  }
   0xc   : > { %2887 = sst [smem:[#allocation16_spill]] %s2360_s30  ;;  %s1406_s12 = sadd.s32 4294967294, %s2368_s10  }
   0xd   : > { %p60_p0 = scmp.ne.s32.totalorder %s2352_s28, %s2348_s27  ;;  %p2459_p1 = scmp.eq.s32.totalorder %s1405_s11, 0 }
   0xe   : > { %p2463_p2 = scmp.eq.s32.totalorder %s1405_s11, 1  ;;  %p237_p3 = scmp.eq.s32.totalorder %s1406_s12, 1 }
   0xf   : > { %s2888_s13 = scalar_select %p2459_p1, 1, 0 }
  0x10   : > { %s2889_s14 = scalar_select %p2463_p2, 1, 0 }
  0x11   : > { %p2469_p4 = por %p2459_p1, %p60_p0  ;;  %p1407_p5 = scmp.ge.s32.totalorder %s2368_s10, 1 }
  0x12   : > { %p2474_p6 = por %p237_p3, %p60_p0  ;;  %p244_p7 = scmp.lt.s32.totalorder %s2368_s10, 3 }
  0x13   : > { %s2890_s15 = scalar_select %p2469_p4, 1, 0 }
  0x14   : > { %s2891_s16 = scalar_select %p2474_p6, 1, 0 }
  0x15   : > { %p2479_p8 = pnand %p1407_p5, %p244_p7  ;;  %s2370_s18 = smov [#allocation5]  }
  0x16   : > { %2892 = sst [smem:[#allocation17_spill]] %s2891_s16  ;;  %s256_s19 = sshll.u32 %s2370_s18, 4  ;;  %s2483_s19 = int_to_ptr.vmem [resolvable:$true] %s256_s19 }
  0x17   : > { %s2893_s17 = scalar_select %p2479_p8, 1, 0 }
  0x18   : > { %p2074_p9 = pneg %p2479_p8  ;;  %s2371_s21 = smov [#allocation7]  }
  0x19   : > { %s269_s22 = sshll.u32 %s2371_s21, 4  ;;  %s2372_s23 = smov [#allocation8]   ;;  %s2494_s22 = int_to_ptr.vmem [resolvable:$true] %s269_s22 }
  0x1a   : > { %p2490_p11 = pnand %p2074_p9, %p2459_p1  ;;  %s2496_s24 = sshll.u32 %s2372_s23, 4  ;;  %s283_s24 = int_to_ptr.vmem [resolvable:$true] %s2496_s24 }
  0x1b   : > { %s2164_s11 = scalar_lea.hbm %s2868_s1, 2048 }
  0x1c   : > { %p2165_p12 = scmp.ne.s32.totalorder %s2868_s1, %s2164_s11  ;;  %p2506_p13 = pneg %p2490_p11 }
  0x1d   : > { %p2171_p5 = scmp.lt.u32.totalorder %s2164_s11, %s2868_s1 }
  0x1e   : > { %p2167_p0 = pnand %p2506_p13, %p2165_p12 }
  0x20   : > { %p2168_p3 = pneg %p2167_p0 }
  0x22   : > { %p2173_p7 = pnand %p2171_p5, %p2168_p3 }
  0x24   : > { %2176 = shalt.err (!%p2173_p7)
}
  0x25   : > { %s2177_s25 = scalar_lea.vmem %s2483_s19, 2048  ;;  %p2185_p1 = scmp.lt.s32.totalorder %s2483_s19, %s2483_s19 }
  0x26   : > { %p2178_p9 = scmp.ne.s32.totalorder %s2483_s19, %s2177_s25  ;;  %p2186_p4 = scmp.lt.s32.totalorder %s2177_s25, %s2177_s25 }
  0x28   : > { %p2180_p10 = pnand %p2178_p9, %p2506_p13  ;;  %p2187_p12 = por %p2186_p4, %p2185_p1 }
  0x2a   : > { %p2181_p6 = pneg %p2180_p10 }
  0x2c   : > { %p2188_p0 = pnand %p2187_p12, %p2181_p6 }
  0x2e   : > { %2191 = shalt.err (!%p2188_p0)
}
  0x2f   : > { %s2373_s26 = smov 128   ;;  %s2374_s11 = smov 8  }
  0x30   : > { %2077 = dma.hbm_to_vmem [thread:$0]  (!%p2490_p11), %s2868_s1, 2048, %s2483_s19, [#allocation6], %s2373_s26, %s2373_s26, %s2374_s11  }
  0x31   : > { %s2192_s25 = scalar_lea.hbm %s2869_s2, 6144 }
  0x32   : > { %p2193_p1 = scmp.ne.s32.totalorder %s2869_s2, %s2192_s25  ;;  %p2199_p10 = scmp.lt.u32.totalorder %s2192_s25, %s2869_s2 }
  0x34   : > { %p2195_p4 = pnand %p2193_p1, %p2506_p13 }
  0x36   : > { %p2196_p6 = pneg %p2195_p4 }
  0x38   : > { %p2201_p3 = pnand %p2199_p10, %p2196_p6 }
  0x3a   : > { %2204 = shalt.err (!%p2201_p3)
}
  0x3b   : > { %s2205_s19 = scalar_lea.vmem %s2494_s22, 6144  ;;  %p2213_p12 = scmp.lt.s32.totalorder %s2494_s22, %s2494_s22 }
  0x3c   : > { %p2206_p5 = scmp.ne.s32.totalorder %s2494_s22, %s2205_s19  ;;  %p2214_p0 = scmp.lt.s32.totalorder %s2205_s19, %s2205_s19 }
  0x3e   : > { %p2208_p7 = pnand %p2206_p5, %p2506_p13  ;;  %p2215_p1 = por %p2214_p0, %p2213_p12 }
  0x40   : > { %p2209_p9 = pneg %p2208_p7 }
  0x42   : > { %p2216_p4 = pnand %p2215_p1, %p2209_p9 }
  0x44   : > { %2219 = shalt.err (!%p2216_p4)
}
  0x45   : > { %2080 = dma.hbm_to_vmem [thread:$0]  (!%p2490_p11), %s2869_s2, 6144, %s2494_s22, [#allocation6], %s2373_s26, %s2373_s26, %s2374_s11  }
  0x46   : > { %s2220_s12 = scalar_lea.hbm %s2870_s3, 8192 }
  0x47   : > { %p2221_p6 = scmp.ne.s32.totalorder %s2870_s3, %s2220_s12  ;;  %p2227_p5 = scmp.lt.u32.totalorder %s2220_s12, %s2870_s3 }
  0x49   : > { %p2223_p10 = pnand %p2221_p6, %p2506_p13 }
  0x4b   : > { %p2224_p3 = pneg %p2223_p10 }
  0x4d   : > { %p2229_p7 = pnand %p2227_p5, %p2224_p3 }
  0x4f   : > { %2232 = shalt.err (!%p2229_p7)
}
  0x50   : > { %s2233_s19 = scalar_lea.vmem %s283_s24, 8192  ;;  %p2241_p1 = scmp.lt.s32.totalorder %s283_s24, %s283_s24 }
  0x51   : > { %p2234_p9 = scmp.ne.s32.totalorder %s283_s24, %s2233_s19  ;;  %p2242_p4 = scmp.lt.s32.totalorder %s2233_s19, %s2233_s19 }
  0x53   : > { %p2236_p12 = pnand %p2234_p9, %p2506_p13  ;;  %p2243_p8 = por %p2242_p4, %p2241_p1 }
  0x55   : > { %p2237_p0 = pneg %p2236_p12 }
  0x57   : > { %p2244_p2 = pnand %p2243_p8, %p2237_p0 }
  0x59   : > { %2247 = shalt.err (!%p2244_p2)
}
  0x5a   : > { %2083 = dma.hbm_to_vmem [thread:$0]  (!%p2490_p11), %s2870_s3, 8192, %s283_s24, [#allocation9], %s2373_s26, %s2373_s26, %s2374_s11  }
  0x5b   : > { %s47_s16 = sadd.s32 1, %s2356_s29  ;;  %s38_s20 = sadd.s32 1, %s2364_s9 }
  0x5c   : > { %p54_p2 = scmp.ne.s32.totalorder %s2356_s29, %s2352_s28  ;;  %p40_p8 = scmp.ge.s32.totalorder %s38_s20, 2 }
  0x5d   : > { %p55_p13 = scmp.eq.s32.totalorder %s2368_s10, 0  ;;  %p2896_p6 = scmp.ne.s32.totalorder %s2889_s14, 0 }
  0x5e   : > { %p2095_p3 = scmp.lt.s32.totalorder %s2368_s10, 2  ;;  %s2916_s20 = smov (%p40_p8, %s38_s20), 0 }
  0x5f   : > { %p2585_p10 = por %p2896_p6, %p54_p2  ;;  %p56_p5 = por %p55_p13, %p54_p2 }
  0x60   : > { %s308_s27 = sand.u32 1, %s2356_s29   ;;  %s42_s30 = ssub.s32 %s2364_s9, %s2916_s20 }
  0x61   : > { %p45_p7 = scmp.eq.s32.totalorder %s42_s30, 0  ;;  %s1412_s24 = sshll.u32 %s308_s27, 3 }
  0x62   : > { %s1413_s26 = sshll.u32 %s2364_s9, 7  ;;  %s312_s21 = scalar_lea.vmem [#allocation2], %s1412_s24 }
  0x63   : > { %s2597_s11 = scalar_select %p45_p7, %s2356_s29, %s47_s16  }
  0x64   : > { %s2602_s14 = scalar_lea.hbm %s2867_s0, %s1413_s26  ;;  %s320_s23 = sshll.u32 %s312_s21, 4  ;;  %s2604_s23 = int_to_ptr.vmem [resolvable:$true] %s320_s23 }
  0x65   : > { %p2608_p11 = pnand %p2095_p3, %p56_p5  ;;  %s309_s19 = scalar_lea.sflag [#allocation3], %s308_s27 }
  0x66   : > { %s2248_s22 = scalar_lea.hbm %s2602_s14, 128  ;;  %s2253_s30 = scalar_lea.hbm %s2867_s0, 256 }
  0x67   : > { %p2249_p9 = scmp.ne.s32.totalorder %s2602_s14, %s2248_s22  ;;  %p2250_p12 = pneg %p2608_p11 }
  0x68   : > { %p2254_p4 = scmp.lt.u32.totalorder %s2602_s14, %s2867_s0  ;;  %p2255_p2 = scmp.lt.u32.totalorder %s2253_s30, %s2248_s22 }
  0x69   : > { %p2251_p0 = pnand %p2250_p12, %p2249_p9  ;;  %p2257_p13 = scmp.lt.u32.totalorder %s2248_s22, %s2602_s14 }
  0x6a   : > { %p2256_p8 = por %p2255_p2, %p2254_p4 }
  0x6b   : > { %p2252_p1 = pneg %p2251_p0 }
  0x6c   : > { %p2258_p6 = por %p2257_p13, %p2256_p8 }
  0x6e   : > { %p2259_p3 = pnand %p2258_p6, %p2252_p1 }
  0x70   : > { %2262 = shalt.err (!%p2259_p3)
}
  0x71   : > { %s2263_s27 = scalar_lea.vmem %s2604_s23, 128  ;;  %s2375_s12 = smov [#allocation2]  }
  0x72   : > { %p2264_p5 = scmp.ne.s32.totalorder %s2604_s23, %s2263_s27  ;;  %s2268_s18 = sshll.u32 %s2375_s12, 4  ;;  %s2269_s18 = int_to_ptr.vmem [resolvable:$false] %s2268_s18 }
  0x73   : > { %s2270_s21 = scalar_lea.vmem %s2269_s18, 256  ;;  %p2271_p0 = scmp.lt.s32.totalorder %s2604_s23, %s2269_s18 }
  0x74   : > { %p2266_p7 = pnand %p2264_p5, %p2250_p12  ;;  %p2272_p4 = scmp.lt.s32.totalorder %s2270_s21, %s2263_s27 }
  0x76   : > { %p2267_p9 = pneg %p2266_p7  ;;  %p2273_p2 = por %p2272_p4, %p2271_p0 }
  0x78   : > { %p2274_p8 = pnand %p2273_p2, %p2267_p9 }
  0x7a   : > { %2277 = shalt.err (!%p2274_p8)
}
  0x7b   : > { %2087 = dma.hbm_to_vmem [thread:$0]  (!%p2608_p11), %s2602_s14, 128, %s2604_s23, %s309_s19  }
  0x7c   : > { %p2899_p1 = scmp.ne.s32.totalorder %s2893_s17, 0 }
  0x7d   : > { %s2640_s22 = sand.u32 (!%p2899_p1), 1, %s2352_s28   ;;  %p2900_p12 = scmp.ne.s32.totalorder (!%p2899_p1), %s2890_s15, 0 }
  0x7e   : > { %329 = sbr.rel (%p2899_p1) target bundleno = 3184 (0xc70), region = 52  ;;  %s1415_s7 = sshll.u32 (!%p2899_p1), %s2640_s22, 3 }
  0x7f   : > { %s332_s16 = scalar_lea.sflag (!%p2899_p1), [#allocation3], %s2640_s22  ;;  %s2644_s30 = scalar_lea.vmem (!%p2899_p1), [#allocation2], %s1415_s7 }
  0x85   : > { %2331 = dma.done.wait (%p2900_p12), %s332_s16, 128  }
  0x86   : > { %2333 = vsyncadd (%p2900_p12), %s332_s16, 4294967168  ;;  %p2901_p11 = scmp.ne.s32.totalorder %s2888_s13, 0 }
  0x88   : > { %2335 = dma.done.wait (%p2901_p11), [#allocation6], 8192  }
  0x89   : > { %2337 = vsyncadd (%p2901_p11), [#allocation6], 4294959104 }
  0x8a   : > { %2339 = dma.done.wait (%p2901_p11), [#allocation9], 8192  }
  0x8b   : > { %2341 = vsyncadd (%p2901_p11), [#allocation9], 4294959104  ;;  %v2376_v0 = vmov 0.0|0.0   ;;  %vm2377_vm0 = vmmov 0   ;;  %v2378_v1 = vmov 0.0   ;;  %v383_v2 = vld [vmem:[#allocation5] sm:$0xff] }
  0x8c   : > { %1866 = vmatprep.subr.bf16.mxu0 %v2376_v0  ;;  %1618 = vmatprep.mubr.msk.f32.mxu0 %vm2377_vm0, %v2378_v1  ;;  %v384_v3 = vld [vmem:[#allocation5 + $0x8] sm:$0xff]  ;;  %v385_v4 = vld [vmem:[#allocation5 + $0x10] sm:$0xff]  ;;  %v386_v6 = vld [vmem:[#allocation5 + $0x18] sm:$0xff]  ;;  %s2902_s26 = sld [smem:[#allocation18_spill]]  ;;  %s2903_s16 = sld [smem:[#allocation16_spill]] }
  0x8d   : > { %1890 = vmatprep.subr.bf16.mxu1 %v2376_v0  ;;  %1653 = vmatprep.mubr.msk.f32.mxu1 %vm2377_vm0, %v2378_v1  ;;  %v1867_v5 = vpack.c.bf16 %v384_v3, %v383_v2  ;;  %v1870_v7 = vpack.c.bf16 %v386_v6, %v385_v4  ;;  %v387_v8 = vld [vmem:[#allocation5 + $0x20] sm:$0xff]  ;;  %v388_v9 = vld [vmem:[#allocation5 + $0x28] sm:$0xff]  ;;  %v401_v12 = vld [vmem:[#allocation8 + $0x10] sm:$0xff]  ;;  %s378_s23 = scalar_lea.vmem [#allocation10], %s2640_s22  ;;  %s2904_s27 = sld [smem:[#allocation19_spill]] }
  0x8e   : > { %v399_v10 = vld [vmem:[#allocation8] sm:$0xff]  ;;  %v400_v11 = vld [vmem:[#allocation8 + $0x8] sm:$0xff]  ;;  %v402_v13 = vld [vmem:[#allocation8 + $0x18] sm:$0xff]  ;;  %v1873_v14 = vpack.c.bf16 %v388_v9, %v387_v8  ;;  %v379_v9 = vlaneseq  ;;  %s1301_s25 = sshll.u32 %s378_s23, 4  ;;  %s1289_s21 = scalar_lea.sflag [#allocation4], %s2640_s22  ;;  %s2820_s25 = int_to_ptr.vmem [resolvable:$true] %s1301_s25 }
  0x8f   : > { %1868 = vmatpush3.bf16.msra.mxu0 %v1867_v5  ;;  %v1891_v15 = vpack.c.bf16 %v400_v11, %v399_v10  ;;  %v389_v16 = vld [vmem:[#allocation5 + $0x30] sm:$0xff]  ;;  %v390_v17 = vld [vmem:[#allocation5 + $0x38] sm:$0xff]  ;;  %v1894_v18 = vpack.c.bf16 %v402_v13, %v401_v12  ;;  %v403_v19 = vld [vmem:[#allocation8 + $0x20] sm:$0xff]  ;;  %s2278_s7 = scalar_lea.vmem %s2820_s25, 16 }
  0x90   : > { %1869 = vmatprep.subr.bf16.mxu0 %v2376_v0  ;;  %v404_v20 = vld [vmem:[#allocation8 + $0x28] sm:$0xff]  ;;  %v1876_v21 = vpack.c.bf16 %v390_v17, %v389_v16  ;;  %v391_v22 = vld [vmem:[#allocation5 + $0x40] sm:$0xff]  ;;  %v405_v25 = vld [vmem:[#allocation8 + $0x30] sm:$0xff]  ;;  %v2694_v10 = vand.u32 127, %v379_v9  ;;  %p2279_p13 = scmp.ne.s32.totalorder %s2820_s25, %s2278_s7 }
  0x91   : > { %1892 = vmatpush3.bf16.msra.mxu1 %v1891_v15  ;;  %v392_v23 = vld [vmem:[#allocation5 + $0x48] sm:$0xff]  ;;  %v1897_v24 = vpack.c.bf16 %v404_v20, %v403_v19  ;;  %v406_v26 = vld [vmem:[#allocation8 + $0x38] sm:$0xff]  ;;  %v393_v28 = vld [vmem:[#allocation5 + $0x50] sm:$0xff] }
  0x92   : > { %1893 = vmatprep.subr.bf16.mxu1 %v2376_v0  ;;  %v1879_v27 = vpack.c.bf16 %v392_v23, %v391_v22  ;;  %v394_v29 = vld [vmem:[#allocation5 + $0x58] sm:$0xff]  ;;  %v1900_v30 = vpack.c.bf16 %v406_v26, %v405_v25  ;;  %v407_v31 = vld [vmem:[#allocation8 + $0x40] sm:$0xff]  ;;  %v408_v32 = vld [vmem:[#allocation8 + $0x48] sm:$0xff]  ;;  %vm381_vm1 = vcmp.lt.s32.totalorder %v2694_v10, 32  ;;  %s1447_s14 = sshll.u32 %s2903_s16, 4  ;;  %p2280_p6 = pnand %p2279_p13, %p2585_p10 }
  0x93   : > { %1871 = vmatpush3.bf16.msra.mxu0 %v1870_v7  ;;  %v1882_v33 = vpack.c.bf16 %v394_v29, %v393_v28  ;;  %v395_v34 = vld [vmem:[#allocation5 + $0x60] sm:$0xff]  ;;  %v396_v35 = vld [vmem:[#allocation5 + $0x68] sm:$0xff]  ;;  %v1903_v36 = vpack.c.bf16 %v408_v32, %v407_v31  ;;  %v409_v37 = vld [vmem:[#allocation8 + $0x50] sm:$0xff]  ;;  %s2905_s12 = smov %s2904_s27  ;;  %s2818_s18 = scalar_lea.hbm %s2904_s27, %s1447_s14 }
  0x94   : > { %1872 = vmatprep.subr.bf16.mxu0 %v2376_v0  ;;  %v410_v38 = vld [vmem:[#allocation8 + $0x58] sm:$0xff]  ;;  %v1885_v39 = vpack.c.bf16 %v396_v35, %v395_v34  ;;  %v397_v40 = vld [vmem:[#allocation5 + $0x70] sm:$0xff]  ;;  %v411_v43 = vld [vmem:[#allocation8 + $0x60] sm:$0xff]  ;;  %p2281_p3 = pneg %p2280_p6  ;;  %s2379_s16 = smov [#allocation10]  }
  0x95   : > { %1895 = vmatpush3.bf16.msra.mxu1 %v1894_v18  ;;  %v398_v41 = vld [vmem:[#allocation5 + $0x78] sm:$0xff]  ;;  %v1906_v42 = vpack.c.bf16 %v410_v38, %v409_v37  ;;  %v412_v44 = vld [vmem:[#allocation8 + $0x68] sm:$0xff]  ;;  %v413_v48 = vld [vmem:[#allocation8 + $0x70] sm:$0xff] }
  0x96   : > { %1896 = vmatprep.subr.bf16.mxu1 %v2376_v0  ;;  %v1888_v45 = vpack.c.bf16 %v398_v41, %v397_v40  ;;  %v1909_v46 = vpack.c.bf16 %v412_v44, %v411_v43  ;;  %v382_v47 = vld [vmem:[%s2644_s30] sm:$0xff]  ;;  %v602_v62 = vld [vmem:[#allocation7] sm:$0xff]  ;;  %v603_v63 = vld [vmem:[#allocation7 + $0x8] sm:$0xff]  ;;  %s2282_s30 = sshll.u32 %s2379_s16, 4  ;;  %s2283_s30 = int_to_ptr.vmem [resolvable:$false] %s2282_s30 }
  0x97   : > { %1874 = vmatpush3.bf16.msra.mxu0 %v1873_v14  ;;  %v414_v49 = vld [vmem:[#allocation8 + $0x78] sm:$0xff]  ;;  %v1419_v51 = vld [vmem:[%s2871_s4] ss:$0 sm:$0xff]  ;;  %v1915_v3 = vpack.c.bf16 %v603_v63, %v602_v62  ;;  %v606_v6 = vld [vmem:[#allocation7 + $0x20] sm:$0xff]  ;;  %s2284_s13 = scalar_lea.vmem %s2283_s30, 32  ;;  %p2285_p5 = scmp.lt.s32.totalorder %s2820_s25, %s2283_s30 }
  0x98   : > { %1875 = vmatprep.subr.bf16.mxu0 %v2376_v0  ;;  %v1912_v50 = vpack.c.bf16 %v414_v49, %v413_v48  ;;  %v1420_v56 = vld [vmem:[%s2872_s5] ss:$0 sm:$0xff]  ;;  %v605_v4 = vld [vmem:[#allocation7 + $0x18] sm:$0xff]  ;;  %v607_v7 = vld [vmem:[#allocation7 + $0x28] sm:$0xff]  ;;  %p2286_p7 = scmp.lt.s32.totalorder %s2284_s13, %s2278_s7 }
  0x99   : > { %1898 = vmatpush3.bf16.msra.mxu1 %v1897_v24  ;;  %v604_v2 = vld [vmem:[#allocation7 + $0x10] sm:$0xff]  ;;  %v1921_v8 = vpack.c.bf16 %v607_v7, %v606_v6  ;;  %v609_v17 = vld [vmem:[#allocation7 + $0x38] sm:$0xff]  ;;  %v610_v19 = vld [vmem:[#allocation7 + $0x40] sm:$0xff] }
  0x9a   : > { %1899 = vmatprep.subr.bf16.mxu1 %v2376_v0  ;;  %v1918_v5 = vpack.c.bf16 %v605_v4, %v604_v2  ;;  %v608_v16 = vld [vmem:[#allocation7 + $0x30] sm:$0xff]  ;;  %v611_v20 = vld [vmem:[#allocation7 + $0x48] sm:$0xff]  ;;  %v613_v23 = vld [vmem:[#allocation7 + $0x58] sm:$0xff]  ;;  %p2287_p9 = por %p2286_p7, %p2285_p5 }
  0x9b   : > { %1877 = vmatpush3.bf16.msra.mxu0 %v1876_v21  ;;  %v1924_v18 = vpack.c.bf16 %v609_v17, %v608_v16  ;;  %v1927_v21 = vpack.c.bf16 %v611_v20, %v610_v19  ;;  %v612_v22 = vld [vmem:[#allocation7 + $0x50] sm:$0xff]  ;;  %v614_v25 = vld [vmem:[#allocation7 + $0x60] sm:$0xff]  ;;  %v615_v26 = vld [vmem:[#allocation7 + $0x68] sm:$0xff] }
  0x9c   : > { %1878 = vmatprep.subr.bf16.mxu0 %v2376_v0  ;;  %v1930_v24 = vpack.c.bf16 %v613_v23, %v612_v22  ;;  %v616_v28 = vld [vmem:[#allocation7 + $0x70] sm:$0xff]  ;;  %v617_v29 = vld [vmem:[#allocation7 + $0x78] sm:$0xff]  ;;  %v619_v31 = vld [vmem:[#allocation8 + $0x80] sm:$0xff]  ;;  %p2288_p0 = pnand %p2287_p9, %p2281_p3 }
  0x9d   : > { %1901 = vmatpush3.bf16.msra.mxu1 %v1900_v30  ;;  %v1936_v30 = vpack.c.bf16 %v617_v29, %v616_v28  ;;  %v620_v32 = vld [vmem:[#allocation8 + $0x88] sm:$0xff]  ;;  %v622_v35 = vld [vmem:[#allocation8 + $0x98] sm:$0xff]  ;;  %v623_v37 = vld [vmem:[#allocation8 + $0xa0] sm:$0xff] }
  0x9e   : > { %1902 = vmatprep.subr.bf16.mxu1 %v2376_v0  ;;  %v1939_v34 = vpack.c.bf16 %v620_v32, %v619_v31  ;;  %v624_v38 = vld [vmem:[#allocation8 + $0xa8] sm:$0xff]  ;;  %v625_v40 = vld [vmem:[#allocation8 + $0xb0] sm:$0xff]  ;;  %v626_v41 = vld [vmem:[#allocation8 + $0xb8] sm:$0xff] }
  0x9f   : > { %1880 = vmatpush3.bf16.msra.mxu0 %v1879_v27  ;;  %v1933_v27 = vpack.c.bf16 %v615_v26, %v614_v25  ;;  %v627_v43 = vld [vmem:[#allocation8 + $0xc0] sm:$0xff]  ;;  %v628_v44 = vld [vmem:[#allocation8 + $0xc8] sm:$0xff]  ;;  %v634_v62 = vld [vmem:[#allocation8 + $0xf8] sm:$0xff] }
  0xa0   : > { %1881 = vmatprep.subr.bf16.mxu0 %v2376_v0  ;;  %v631_v49 = vld [vmem:[#allocation8 + $0xe0] sm:$0xff]  ;;  %v1424_v2 = vld [vmem:[%s2871_s4 + $0x1] ss:$0 sm:$0xff]  ;;  %v832_v29 = vld [vmem:[#allocation7 + $0xb8] sm:$0xff] }
  0xa1   : > { %1904 = vmatpush3.bf16.msra.mxu1 %v1903_v36  ;;  %v1426_v7 = vld [vmem:[%s2872_s5 + $0x1] ss:$0 sm:$0xff]  ;;  %v829_v20 = vld [vmem:[#allocation7 + $0xa0] sm:$0xff]  ;;  %v834_v32 = vld [vmem:[#allocation7 + $0xc8] sm:$0xff] }
  0xa2   : > { %1905 = vmatprep.subr.bf16.mxu1 %v2376_v0  ;;  %v827_v16 = vld [vmem:[#allocation7 + $0x90] sm:$0xff]  ;;  %v833_v31 = vld [vmem:[#allocation7 + $0xc0] sm:$0xff] }
  0xa3   : > { %1883 = vmatpush3.bf16.msra.mxu0 %v1882_v33  ;;  %v621_v33 = vld [vmem:[#allocation8 + $0x90] sm:$0xff] }
  0xa4   : > { %1884 = vmatprep.subr.bf16.mxu0 %v2376_v0  ;;  %v1942_v36 = vpack.c.bf16 %v622_v35, %v621_v33  ;;  %v831_v28 = vld [vmem:[#allocation7 + $0xb0] sm:$0xff]  ;;  %v1975_v33 = vpack.c.bf16 %v834_v32, %v833_v31  ;;  %v836_v35 = vld [vmem:[#allocation7 + $0xd8] sm:$0xff]  ;;  %v1053_v32 = vld [vmem:[#allocation7 + $0x128] sm:$0xff] }
  0xa5   : > { %1907 = vmatpush3.bf16.msra.mxu1 %v1906_v42  ;;  %v1948_v42 = vpack.c.bf16 %v626_v41, %v625_v40  ;;  %v839_v40 = vld [vmem:[#allocation7 + $0xf0] sm:$0xff]  ;;  %v840_v41 = vld [vmem:[#allocation7 + $0xf8] sm:$0xff] }
  0xa6   : > { %1908 = vmatprep.subr.bf16.mxu1 %v2376_v0  ;;  %v1446_v10 = vld [vmem:[%s2902_s26 + $0x3] ss:$0 sm:$0xff] }
  0xa7   : > { %1886 = vmatpush3.bf16.msra.mxu0 %v1885_v39  ;;  %v1945_v39 = vpack.c.bf16 %v624_v38, %v623_v37  ;;  %v837_v37 = vld [vmem:[#allocation7 + $0xe0] sm:$0xff]  ;;  %v838_v38 = vld [vmem:[#allocation7 + $0xe8] sm:$0xff] }
  0xa8   : > { %1887 = vmatprep.subr.bf16.mxu0 %v2376_v0 }
  0xa9   : > { %1910 = vmatpush3.bf16.msra.mxu1 %v1909_v46  ;;  %v629_v46 = vld [vmem:[#allocation8 + $0xd0] sm:$0xff] }
  0xaa   : > { %1911 = vmatprep.subr.bf16.mxu1 %v2376_v0 }
  0xab   : > { %1889 = vmatpush3.bf16.msra.mxu0 %v1888_v45  ;;  %v1951_v45 = vpack.c.bf16 %v628_v44, %v627_v43  ;;  %v842_v43 = vld [vmem:[#allocation8 + $0x100] sm:$0xff]  ;;  %v843_v44 = vld [vmem:[#allocation8 + $0x108] sm:$0xff] }
  0xac   : > { %1914 = vmatprep.subr.bf16.mxu0 %v2376_v0 }
  0xad   : > { %1913 = vmatpush3.bf16.msra.mxu1 %v1912_v50  ;;  %v632_v50 = vld [vmem:[#allocation8 + $0xe8] sm:$0xff] }
  0xae   : > { %1619 = vmatmul.mubr.f32.vlgmr.msra.gmra.mrb[0].mxu0 %v382_v47  ;;  %1938 = vmatprep.subr.bf16.mxu1 %v2376_v0  ;;  %v630_v47 = vld [vmem:[#allocation8 + $0xd8] sm:$0xff] }
  0xaf   : > { %1688 = vmatprep.mubr.msk.f32.mxu0 %vm2377_vm0, %v2378_v1  ;;  %1916 = vmatpush3.bf16.msra.mxu0 %v1915_v3  ;;  %v1954_v48 = vpack.c.bf16 %v630_v47, %v629_v46  ;;  %v1987_v46 = vpack.c.bf16 %v843_v44, %v842_v43  ;;  %v845_v47 = vld [vmem:[#allocation8 + $0x118] sm:$0xff]  ;;  %v1057_v43 = vld [vmem:[#allocation7 + $0x148] sm:$0xff] }
  0xb0   : > { %1917 = vmatprep.subr.bf16.mxu0 %v2376_v0 }
  0xb3   : > { %1919 = vmatpush3.bf16.msra.mxu0 %v1918_v5 }
  0xb4   : > { %1920 = vmatprep.subr.bf16.mxu0 %v2376_v0 }
  0xb7   : > { %1922 = vmatpush3.bf16.msra.mxu0 %v1921_v8 }
  0xb8   : > { %1923 = vmatprep.subr.bf16.mxu0 %v2376_v0 }
  0xbb   : > { %1925 = vmatpush3.bf16.msra.mxu0 %v1924_v18  ;;  %v828_v18 = vld [vmem:[#allocation7 + $0x98] sm:$0xff] }
  0xbc   : > { %1926 = vmatprep.subr.bf16.mxu0 %v2376_v0  ;;  %v1966_v19 = vpack.c.bf16 %v828_v18, %v827_v16 }
  0xbf   : > { %1928 = vmatpush3.bf16.msra.mxu0 %v1927_v21  ;;  %v830_v21 = vld [vmem:[#allocation7 + $0xa8] sm:$0xff] }
  0xc0   : > { %1929 = vmatprep.subr.bf16.mxu0 %v2376_v0  ;;  %v1969_v22 = vpack.c.bf16 %v830_v21, %v829_v20  ;;  %v1434_v20 = vld [vmem:[%s2872_s5 + $0x2] ss:$0 sm:$0xff] }
  0xc3   : > { %1931 = vmatpush3.bf16.msra.mxu0 %v1930_v24 }
  0xc4   : > { %1932 = vmatprep.subr.bf16.mxu0 %v2376_v0 }
  0xc7   : > { %1934 = vmatpush3.bf16.msra.mxu0 %v1933_v27 }
  0xc8   : > { %1935 = vmatprep.subr.bf16.mxu0 %v2376_v0 }
  0xcb   : > { %1937 = vmatpush3.bf16.msra.mxu0 %v1936_v30  ;;  %v1972_v30 = vpack.c.bf16 %v832_v29, %v831_v28  ;;  %v1050_v28 = vld [vmem:[#allocation7 + $0x110] sm:$0xff] }
  0xcc   : > { %1962 = vmatprep.subr.bf16.mxu0 %v2376_v0 }
 0x181   : > { %v488_v52 = vpop.f32.mrb[0].mxu0 }
 0x182   : > { %v489_v53 = vadd.f32 %v1419_v51, %v488_v52  ;;  %v1620_v54 = vpop.f32.mrb[1].mxu0  ;;  %v1957_v51 = vpack.c.bf16 %v632_v50, %v631_v49  ;;  %v846_v49 = vld [vmem:[#allocation8 + $0x120] sm:$0xff]  ;;  %v847_v50 = vld [vmem:[#allocation8 + $0x128] sm:$0xff] }
 0x184   : > { %v492_v55 = vmax.f32 %v489_v53, 0.0 }
 0x186   : > { %1654 = vmatmul.mubr.f32.vlgmr.msra.gmra.mrb[0].mxu1 %v492_v55 }
 0x187   : > { %1723 = vmatprep.mubr.msk.f32.mxu1 %vm2377_vm0, %v2378_v1  ;;  %1940 = vmatpush3.bf16.msra.mxu1 %v1939_v34  ;;  %v835_v34 = vld [vmem:[#allocation7 + $0xd0] sm:$0xff] }
 0x188   : > { %1941 = vmatprep.subr.bf16.mxu1 %v2376_v0 }
 0x18b   : > { %1943 = vmatpush3.bf16.msra.mxu1 %v1942_v36  ;;  %v1978_v36 = vpack.c.bf16 %v836_v35, %v835_v34 }
 0x18c   : > { %1944 = vmatprep.subr.bf16.mxu1 %v2376_v0 }
 0x18f   : > { %1946 = vmatpush3.bf16.msra.mxu1 %v1945_v39  ;;  %v1981_v39 = vpack.c.bf16 %v838_v38, %v837_v37 }
 0x190   : > { %1947 = vmatprep.subr.bf16.mxu1 %v2376_v0 }
 0x193   : > { %1949 = vmatpush3.bf16.msra.mxu1 %v1948_v42  ;;  %v1984_v42 = vpack.c.bf16 %v840_v41, %v839_v40  ;;  %v1055_v40 = vld [vmem:[#allocation7 + $0x138] sm:$0xff] }
 0x194   : > { %1950 = vmatprep.subr.bf16.mxu1 %v2376_v0 }
 0x197   : > { %1952 = vmatpush3.bf16.msra.mxu1 %v1951_v45  ;;  %v844_v45 = vld [vmem:[#allocation8 + $0x110] sm:$0xff] }
 0x198   : > { %1953 = vmatprep.subr.bf16.mxu1 %v2376_v0 }
 0x19b   : > { %1955 = vmatpush3.bf16.msra.mxu1 %v1954_v48  ;;  %v1990_v48 = vpack.c.bf16 %v845_v47, %v844_v45  ;;  %v1058_v45 = vld [vmem:[#allocation7 + $0x150] sm:$0xff] }
 0x19c   : > { %1956 = vmatprep.subr.bf16.mxu1 %v2376_v0 }
 0x19f   : > { %1958 = vmatpush3.bf16.msra.mxu1 %v1957_v51  ;;  %v1993_v51 = vpack.c.bf16 %v847_v50, %v846_v49  ;;  %v1061_v49 = vld [vmem:[#allocation7 + $0x168] sm:$0xff] }
 0x1a0   : > { %1959 = vmatprep.subr.bf16.mxu1 %v2376_v0 }
 0x259   : > { %v566_v57 = vpop.f32.mrb[0].mxu1 }
 0x25a   : > { %v567_v58 = vadd.f32 %v1420_v56, %v566_v57  ;;  %v1655_v59 = vpop.f32.mrb[1].mxu1  ;;  %v1421_v56 = vld [vmem:[%s2873_s6] ss:$0 sm:$0xff] }
 0x25c   : > { %v570_v60 = vmax.f32 %v567_v58, 0.0  ;;  %v1422_v58 = vld [vmem:[%s2902_s26] ss:$0 sm:$0xff] }
 0x25e   : > { %v571_v61 = vadd.f32 %v570_v60, %v492_v55 }
 0x260   : > { %572 = vadd.xlane.f32.xlu0 %v571_v61 }
 0x2ed   : > { %v573_v11 = vpop.xlane.xlu0 %572 }
 0x2ee   : > { %v574_v12 = vmul.f32 0.03125, %v573_v11 }
 0x2f0   : > { %v575_v13 = vsub.f32 %v571_v61, %v574_v12  ;;  %v633_v61 = vld [vmem:[#allocation8 + $0xf0] sm:$0xff] }
 0x2f1   : > { %v1960_v63 = vpack.c.bf16 %v634_v62, %v633_v61  ;;  %v854_v61 = vld [vmem:[#allocation8 + $0x160] sm:$0xff]  ;;  %v855_v62 = vld [vmem:[#allocation8 + $0x168] sm:$0xff] }
 0x2f2   : > { %v2699_v14 = vsel %vm381_vm1, %v575_v13, 0.0 }
 0x2f3   : > { %v579_v15 = vmul.f32 %v2699_v14, %v2699_v14  ;;  %1961 = vmatpush3.bf16.msra.mxu1 %v1960_v63  ;;  %v2005_v63 = vpack.c.bf16 %v855_v62, %v854_v61  ;;  %v1070_v61 = vld [vmem:[#allocation8 + $0x1a8] sm:$0xff] }
 0x2f4   : > { %1986 = vmatprep.subr.bf16.mxu1 %v2376_v0 }
 0x2f5   : > { %580 = vadd.xlane.f32.xlu0 %v579_v15  ;;  %v826_v15 = vld [vmem:[#allocation7 + $0x88] sm:$0xff] }
 0x382   : > { %v581_v52 = vpop.xlane.xlu0 %580 }
 0x383   : > { %v582_v53 = vmul.f32 0.03125, %v581_v52  ;;  %v848_v52 = vld [vmem:[#allocation8 + $0x130] sm:$0xff] }
 0x385   : > { %v583_v54 = vadd.f32 1e-05, %v582_v53  ;;  %v849_v53 = vld [vmem:[#allocation8 + $0x138] sm:$0xff] }
 0x387   : > { %2156 = vrsqrt.f32 %v583_v54  ;;  %v1996_v54 = vpack.c.bf16 %v849_v53, %v848_v52  ;;  %v1063_v52 = vld [vmem:[#allocation7 + $0x178] sm:$0xff] }
 0x391   : > { %v2157_v55 = vpop.eup %2156 }
 0x392   : > { %v585_v57 = vmul.f32 %v2157_v55, %v2699_v14  ;;  %v825_v14 = vld [vmem:[#allocation7 + $0x80] sm:$0xff] }
 0x393   : > { %v1963_v17 = vpack.c.bf16 %v826_v15, %v825_v14  ;;  %v850_v55 = vld [vmem:[#allocation8 + $0x140] sm:$0xff]  ;;  %v1432_v15 = vld [vmem:[%s2871_s4 + $0x2] ss:$0 sm:$0xff] }
 0x394   : > { %v593_v59 = vmul.f32 %v1421_v56, %v585_v57  ;;  %v851_v56 = vld [vmem:[#allocation8 + $0x148] sm:$0xff] }
 0x395   : > { %v1999_v57 = vpack.c.bf16 %v851_v56, %v850_v55  ;;  %v1066_v55 = vld [vmem:[#allocation8 + $0x188] sm:$0xff]  ;;  %v1067_v56 = vld [vmem:[#allocation8 + $0x190] sm:$0xff] }
 0x396   : > { %v601_v60 = vadd.f32 %v1422_v58, %v593_v59  ;;  %v852_v58 = vld [vmem:[#allocation8 + $0x150] sm:$0xff]  ;;  %v853_v59 = vld [vmem:[#allocation8 + $0x158] sm:$0xff] }
 0x398   : > { %1689 = vmatmul.mubr.f32.vlgmr.msra.gmra.mrb[2].mxu0 %v601_v60  ;;  %v2002_v60 = vpack.c.bf16 %v853_v59, %v852_v58  ;;  %v1068_v58 = vld [vmem:[#allocation8 + $0x198] sm:$0xff] }
 0x399   : > { %1758 = vmatprep.mubr.msk.f32.mxu0 %vm2377_vm0, %v2378_v1  ;;  %1964 = vmatpush3.bf16.msra.mxu0 %v1963_v17  ;;  %v2038_v59 = vpack.c.bf16 %v1068_v58, %v1067_v56 }
 0x39a   : > { %1965 = vmatprep.subr.bf16.mxu0 %v2376_v0 }
 0x39d   : > { %1967 = vmatpush3.bf16.msra.mxu0 %v1966_v19 }
 0x39e   : > { %1968 = vmatprep.subr.bf16.mxu0 %v2376_v0 }
 0x3a1   : > { %1970 = vmatpush3.bf16.msra.mxu0 %v1969_v22 }
 0x3a2   : > { %1971 = vmatprep.subr.bf16.mxu0 %v2376_v0 }
 0x3a5   : > { %1973 = vmatpush3.bf16.msra.mxu0 %v1972_v30  ;;  %v1051_v30 = vld [vmem:[#allocation7 + $0x118] sm:$0xff] }
 0x3a6   : > { %1974 = vmatprep.subr.bf16.mxu0 %v2376_v0  ;;  %v2014_v31 = vpack.c.bf16 %v1051_v30, %v1050_v28  ;;  %v1442_v30 = vld [vmem:[%s2872_s5 + $0x3] ss:$0 sm:$0xff] }
 0x3a9   : > { %1976 = vmatpush3.bf16.msra.mxu0 %v1975_v33 }
 0x3aa   : > { %1977 = vmatprep.subr.bf16.mxu0 %v2376_v0 }
 0x3ad   : > { %1979 = vmatpush3.bf16.msra.mxu0 %v1978_v36 }
 0x3ae   : > { %1980 = vmatprep.subr.bf16.mxu0 %v2376_v0 }
 0x3b1   : > { %1982 = vmatpush3.bf16.msra.mxu0 %v1981_v39  ;;  %v1054_v39 = vld [vmem:[#allocation7 + $0x130] sm:$0xff] }
 0x3b2   : > { %1983 = vmatprep.subr.bf16.mxu0 %v2376_v0  ;;  %v2020_v41 = vpack.c.bf16 %v1055_v40, %v1054_v39 }
 0x3b5   : > { %1985 = vmatpush3.bf16.msra.mxu0 %v1984_v42  ;;  %v1056_v42 = vld [vmem:[#allocation7 + $0x140] sm:$0xff] }
 0x3b6   : > { %2010 = vmatprep.subr.bf16.mxu0 %v2376_v0  ;;  %v2023_v44 = vpack.c.bf16 %v1057_v43, %v1056_v42 }
 0x46b   : > { %v709_v3 = vpop.f32.mrb[2].mxu0 }
 0x46c   : > { %v710_v4 = vadd.f32 %v1424_v2, %v709_v3  ;;  %v1690_v5 = vpop.f32.mrb[3].mxu0 }
 0x46e   : > { %v713_v6 = vmax.f32 %v710_v4, 0.0 }
 0x470   : > { %1724 = vmatmul.mubr.f32.vlgmr.msra.gmra.mrb[2].mxu1 %v713_v6 }
 0x471   : > { %1793 = vmatprep.mubr.msk.f32.mxu1 %vm2377_vm0, %v2378_v1  ;;  %1988 = vmatpush3.bf16.msra.mxu1 %v1987_v46  ;;  %v1059_v46 = vld [vmem:[#allocation7 + $0x158] sm:$0xff] }
 0x472   : > { %1989 = vmatprep.subr.bf16.mxu1 %v2376_v0  ;;  %v2026_v47 = vpack.c.bf16 %v1059_v46, %v1058_v45 }
 0x475   : > { %1991 = vmatpush3.bf16.msra.mxu1 %v1990_v48  ;;  %v1060_v48 = vld [vmem:[#allocation7 + $0x160] sm:$0xff] }
 0x476   : > { %1992 = vmatprep.subr.bf16.mxu1 %v2376_v0  ;;  %v2029_v50 = vpack.c.bf16 %v1061_v49, %v1060_v48 }
 0x479   : > { %1994 = vmatpush3.bf16.msra.mxu1 %v1993_v51  ;;  %v1062_v51 = vld [vmem:[#allocation7 + $0x170] sm:$0xff] }
 0x47a   : > { %1995 = vmatprep.subr.bf16.mxu1 %v2376_v0  ;;  %v2032_v53 = vpack.c.bf16 %v1063_v52, %v1062_v51 }
 0x47d   : > { %1997 = vmatpush3.bf16.msra.mxu1 %v1996_v54  ;;  %v1065_v54 = vld [vmem:[#allocation8 + $0x180] sm:$0xff] }
 0x47e   : > { %1998 = vmatprep.subr.bf16.mxu1 %v2376_v0 }
 0x481   : > { %2000 = vmatpush3.bf16.msra.mxu1 %v1999_v57  ;;  %v2035_v57 = vpack.c.bf16 %v1066_v55, %v1065_v54 }
 0x482   : > { %2001 = vmatprep.subr.bf16.mxu1 %v2376_v0 }
 0x485   : > { %2003 = vmatpush3.bf16.msra.mxu1 %v2002_v60  ;;  %v1069_v60 = vld [vmem:[#allocation8 + $0x1a0] sm:$0xff] }
 0x486   : > { %2004 = vmatprep.subr.bf16.mxu1 %v2376_v0  ;;  %v2041_v62 = vpack.c.bf16 %v1070_v61, %v1069_v60 }
 0x489   : > { %2006 = vmatpush3.bf16.msra.mxu1 %v2005_v63  ;;  %v1071_v63 = vld [vmem:[#allocation8 + $0x1b0] sm:$0xff] }
 0x48a   : > { %2007 = vmatprep.subr.bf16.mxu1 %v2376_v0 }
 0x543   : > { %v788_v8 = vpop.f32.mrb[2].mxu1 }
 0x544   : > { %v789_v9 = vadd.f32 %v1426_v7, %v788_v8  ;;  %v1725_v11 = vpop.f32.mrb[3].mxu1  ;;  %v1430_v8 = vld [vmem:[%s2902_s26 + $0x1] ss:$0 sm:$0xff] }
 0x546   : > { %v792_v12 = vmax.f32 %v789_v9, 0.0 }
 0x548   : > { %v793_v13 = vadd.f32 %v792_v12, %v713_v6  ;;  %v1428_v6 = vld [vmem:[%s2873_s6 + $0x1] ss:$0 sm:$0xff] }
 0x549   : > { %v856_v12 = vld [vmem:[#allocation8 + $0x170] sm:$0xff] }
 0x54a   : > { %794 = vadd.xlane.f32.xlu1 %v793_v13 }
 0x5d7   : > { %v795_v23 = vpop.xlane.xlu1 %794 }
 0x5d8   : > { %v796_v24 = vmul.f32 0.03125, %v795_v23 }
 0x5da   : > { %v797_v25 = vsub.f32 %v793_v13, %v796_v24  ;;  %v857_v13 = vld [vmem:[#allocation8 + $0x178] sm:$0xff] }
 0x5db   : > { %v2008_v14 = vpack.c.bf16 %v857_v13, %v856_v12  ;;  %v1078_v12 = vld [vmem:[#allocation8 + $0x1e8] sm:$0xff] }
 0x5dc   : > { %v2738_v26 = vsel %vm381_vm1, %v797_v25, 0.0 }
 0x5dd   : > { %v799_v27 = vmul.f32 %v2738_v26, %v2738_v26  ;;  %2009 = vmatpush3.bf16.msra.mxu1 %v2008_v14 }
 0x5de   : > { %2034 = vmatprep.subr.bf16.mxu1 %v2376_v0 }
 0x5df   : > { %800 = vadd.xlane.f32.xlu1 %v799_v27  ;;  %v1049_v27 = vld [vmem:[#allocation7 + $0x108] sm:$0xff] }
 0x66c   : > { %v801_v2 = vpop.xlane.xlu1 %800 }
 0x66d   : > { %v802_v3 = vmul.f32 0.03125, %v801_v2  ;;  %v1072_v2 = vld [vmem:[#allocation8 + $0x1b8] sm:$0xff] }
 0x66f   : > { %v803_v4 = vadd.f32 1e-05, %v802_v3  ;;  %v2044_v3 = vpack.c.bf16 %v1072_v2, %v1071_v63 }
 0x671   : > { %2158 = vrsqrt.f32 %v803_v4  ;;  %v1073_v4 = vld [vmem:[#allocation8 + $0x1c0] sm:$0xff] }
 0x67b   : > { %v2159_v5 = vpop.eup %2158 }
 0x67c   : > { %v805_v7 = vmul.f32 %v2159_v5, %v2738_v26  ;;  %v1048_v26 = vld [vmem:[#allocation7 + $0x100] sm:$0xff]  ;;  %v1074_v5 = vld [vmem:[#allocation8 + $0x1c8] sm:$0xff] }
 0x67d   : > { %v2011_v29 = vpack.c.bf16 %v1049_v27, %v1048_v26 }
 0x67e   : > { %v814_v9 = vmul.f32 %v1428_v6, %v805_v7  ;;  %v2047_v6 = vpack.c.bf16 %v1074_v5, %v1073_v4  ;;  %v1075_v7 = vld [vmem:[#allocation8 + $0x1d0] sm:$0xff] }
 0x680   : > { %v823_v11 = vadd.f32 %v1430_v8, %v814_v9  ;;  %v1076_v8 = vld [vmem:[#allocation8 + $0x1d8] sm:$0xff] }
 0x681   : > { %v2050_v9 = vpack.c.bf16 %v1076_v8, %v1075_v7 }
 0x682   : > { %1759 = vmatmul.mubr.f32.vlgmr.msra.gmra.mrb[4].mxu0 %v823_v11  ;;  %v1077_v11 = vld [vmem:[#allocation8 + $0x1e0] sm:$0xff] }
 0x683   : > { %1828 = vmatprep.mubr.msk.f32.mxu0 %vm2377_vm0, %v2378_v1  ;;  %2012 = vmatpush3.bf16.msra.mxu0 %v2011_v29  ;;  %v2053_v13 = vpack.c.bf16 %v1078_v12, %v1077_v11 }
 0x684   : > { %2013 = vmatprep.subr.bf16.mxu0 %v2376_v0 }
 0x687   : > { %2015 = vmatpush3.bf16.msra.mxu0 %v2014_v31 }
 0x688   : > { %2016 = vmatprep.subr.bf16.mxu0 %v2376_v0 }
 0x755   : > { %v932_v16 = vpop.f32.mrb[4].mxu0 }
 0x756   : > { %v933_v17 = vadd.f32 %v1432_v15, %v932_v16  ;;  %v1760_v18 = vpop.f32.mrb[5].mxu0 }
 0x757   : > { %v1436_v18 = vld [vmem:[%s2873_s6 + $0x2] ss:$0 sm:$0xff] }
 0x758   : > { %v936_v19 = vmax.f32 %v933_v17, 0.0 }
 0x75a   : > { %1794 = vmatmul.mubr.f32.vlgmr.msra.gmra.mrb[4].mxu1 %v936_v19 }
 0x75b   : > { %1863 = vmatprep.mubr.msk.f32.mxu1 %vm2377_vm0, %v2378_v1  ;;  %v1052_v1 = vld [vmem:[#allocation7 + $0x120] sm:$0xff]  ;;  %2036 = vmatpush3.bf16.msra.mxu1 %v2035_v57 }
 0x75c   : > { %v2017_v33 = vpack.c.bf16 %v1053_v32, %v1052_v1  ;;  %2037 = vmatprep.subr.bf16.mxu1 %v2376_v0 }
 0x75e   : > { %2018 = vmatpush3.bf16.msra.mxu0 %v2017_v33 }
 0x75f   : > { %2019 = vmatprep.subr.bf16.mxu0 %v2376_v0  ;;  %2039 = vmatpush3.bf16.msra.mxu1 %v2038_v59 }
 0x760   : > { %2040 = vmatprep.subr.bf16.mxu1 %v2376_v0 }
 0x762   : > { %2021 = vmatpush3.bf16.msra.mxu0 %v2020_v41 }
 0x763   : > { %2022 = vmatprep.subr.bf16.mxu0 %v2376_v0  ;;  %2042 = vmatpush3.bf16.msra.mxu1 %v2041_v62 }
 0x764   : > { %2043 = vmatprep.subr.bf16.mxu1 %v2376_v0 }
 0x766   : > { %2024 = vmatpush3.bf16.msra.mxu0 %v2023_v44  ;;  %v1444_v44 = vld [vmem:[%s2873_s6 + $0x3] ss:$0 sm:$0xff] }
 0x767   : > { %2025 = vmatprep.subr.bf16.mxu0 %v2376_v0  ;;  %2045 = vmatpush3.bf16.msra.mxu1 %v2044_v3 }
 0x768   : > { %2046 = vmatprep.subr.bf16.mxu1 %v2376_v0 }
 0x76a   : > { %2027 = vmatpush3.bf16.msra.mxu0 %v2026_v47 }
 0x76b   : > { %2028 = vmatprep.subr.bf16.mxu0 %v2376_v0  ;;  %2048 = vmatpush3.bf16.msra.mxu1 %v2047_v6 }
 0x76c   : > { %2049 = vmatprep.subr.bf16.mxu1 %v2376_v0 }
 0x76e   : > { %2030 = vmatpush3.bf16.msra.mxu0 %v2029_v50 }
 0x76f   : > { %2031 = vmatprep.subr.bf16.mxu0 %v2376_v0  ;;  %2051 = vmatpush3.bf16.msra.mxu1 %v2050_v9 }
 0x770   : > { %2052 = vmatprep.subr.bf16.mxu1 %v2376_v0 }
 0x772   : > { %2033 = vmatpush3.bf16.msra.mxu0 %v2032_v53 }
 0x773   : > { %2054 = vmatpush3.bf16.msra.mxu1 %v2053_v13 }
 0x774   : > { %2055 = vmatprep.subr.bf16.mxu1 %v2376_v0  ;;  %v1080_v0 = vld [vmem:[#allocation8 + $0x1f8] sm:$0xff] }
 0x82d   : > { %v1011_v21 = vpop.f32.mrb[4].mxu1 }
 0x82e   : > { %v1012_v22 = vadd.f32 %v1434_v20, %v1011_v21  ;;  %v1795_v23 = vpop.f32.mrb[5].mxu1  ;;  %v1438_v20 = vld [vmem:[%s2902_s26 + $0x2] ss:$0 sm:$0xff] }
 0x82f   : > { %v1079_v23 = vld [vmem:[#allocation8 + $0x1f0] sm:$0xff] }
 0x830   : > { %v1015_v24 = vmax.f32 %v1012_v22, 0.0 }
 0x832   : > { %v1016_v25 = vadd.f32 %v1015_v24, %v936_v19  ;;  %v2056_v24 = vpack.c.bf16 %v1080_v0, %v1079_v23 }
 0x834   : > { %1017 = vadd.xlane.f32.xlu0 %v1016_v25  ;;  %2057 = vmatpush3.bf16.msra.mxu1 %v2056_v24 }
 0x8c1   : > { %v1018_v34 = vpop.xlane.xlu0 %1017 }
 0x8c2   : > { %v1019_v35 = vmul.f32 0.03125, %v1018_v34 }
 0x8c4   : > { %v1020_v36 = vsub.f32 %v1016_v25, %v1019_v35  ;;  %v1440_v25 = vld [vmem:[%s2871_s4 + $0x3] ss:$0 sm:$0xff] }
 0x8c6   : > { %v2777_v37 = vsel %vm381_vm1, %v1020_v36, 0.0 }
 0x8c7   : > { %v1022_v38 = vmul.f32 %v2777_v37, %v2777_v37 }
 0x8c9   : > { %1023 = vadd.xlane.f32.xlu1 %v1022_v38 }
 0x956   : > { %v1024_v14 = vpop.xlane.xlu1 %1023 }
 0x957   : > { %v1025_v15 = vmul.f32 0.03125, %v1024_v14 }
 0x959   : > { %v1026_v16 = vadd.f32 1e-05, %v1025_v15 }
 0x95b   : > { %2160 = vrsqrt.f32 %v1026_v16 }
 0x965   : > { %v2161_v17 = vpop.eup %2160 }
 0x966   : > { %v1028_v19 = vmul.f32 %v2161_v17, %v2777_v37 }
 0x968   : > { %v1037_v21 = vmul.f32 %v1436_v18, %v1028_v19 }
 0x96a   : > { %v1046_v22 = vadd.f32 %v1438_v20, %v1037_v21 }
 0x96c   : > { %1829 = vmatmul.mubr.f32.vlgmr.msra.gmra.mrb[6].mxu0 %v1046_v22 }
 0xa3f   : > { %v1155_v26 = vpop.f32.mrb[6].mxu0 }
 0xa40   : > { %v1156_v27 = vadd.f32 %v1440_v25, %v1155_v26  ;;  %v1830_v28 = vpop.f32.mrb[7].mxu0 }
 0xa42   : > { %v1159_v29 = vmax.f32 %v1156_v27, 0.0 }
 0xa44   : > { %1864 = vmatmul.mubr.f32.vlgmr.msra.gmra.mrb[6].mxu1 %v1159_v29 }
 0xb17   : > { %v1234_v31 = vpop.f32.mrb[6].mxu1 }
 0xb18   : > { %v1235_v1 = vadd.f32 %v1442_v30, %v1234_v31  ;;  %v1865_v32 = vpop.f32.mrb[7].mxu1 }
 0xb1a   : > { %v1238_v33 = vmax.f32 %v1235_v1, 0.0 }
 0xb1c   : > { %v1239_v34 = vadd.f32 %v1238_v33, %v1159_v29 }
 0xb1e   : > { %1240 = vadd.xlane.f32.xlu0 %v1239_v34 }
 0xbab   : > { %v1241_v35 = vpop.xlane.xlu0 %1240 }
 0xbac   : > { %v1242_v36 = vmul.f32 0.03125, %v1241_v35 }
 0xbae   : > { %v1243_v37 = vsub.f32 %v1239_v34, %v1242_v36 }
 0xbb0   : > { %v1244_v38 = vsel %vm381_vm1, %v1243_v37, 0.0 }
 0xbb1   : > { %v1245_v39 = vmul.f32 %v1244_v38, %v1244_v38 }
 0xbb3   : > { %1246 = vadd.xlane.f32.xlu1 %v1245_v39 }
 0xc40   : > { %v1247_v40 = vpop.xlane.xlu1 %1246 }
 0xc41   : > { %v1248_v41 = vmul.f32 0.03125, %v1247_v40 }
 0xc43   : > { %v1249_v42 = vadd.f32 1e-05, %v1248_v41 }
 0xc45   : > { %2162 = vrsqrt.f32 %v1249_v42 }
 0xc4f   : > { %v2163_v43 = vpop.eup %2162 }
 0xc50   : > { %v1251_v45 = vmul.f32 %v2163_v43, %v1244_v38 }
 0xc52   : > { %v1260_v46 = vmul.f32 %v1444_v44, %v1251_v45 }
 0xc54   : > { %v1269_v47 = vadd.f32 %v1446_v10, %v1260_v46 }
 0xc56   : > { %v1270_v48 = vrot.slane %v1269_v47, 4 }
 0xc58   : > { %v1271_v49 = vmax.f32 %v1269_v47, %v1270_v48 }
 0xc5a   : > { %v1272_v50 = vrot.slane %v1271_v49, 2 }
 0xc5c   : > { %v1273_v51 = vmax.f32 %v1271_v49, %v1272_v50 }
 0xc5e   : > { %v1274_v52 = vrot.slane %v1273_v51, 1 }
 0xc60   : > { %v1275_v53 = vmax.f32 %v1273_v51, %v1274_v52 }
 0xc62   : > { %1280 = vst [vmem:[%s378_s23] sm:$0x1] %v1275_v53 }
 0xc63   : > { %2291 = shalt.err (!%p2288_p0)
}
 0xc64   : > { %s2292_s22 = scalar_lea.hbm %s2818_s18, 16  ;;  %s2296_s14 = scalar_lea.hbm %s2905_s12, 32 }
 0xc65   : > { %p2293_p4 = scmp.ne.s32.totalorder %s2818_s18, %s2292_s22  ;;  %p2297_p1 = scmp.lt.u32.totalorder %s2818_s18, %s2905_s12 }
 0xc66   : > { %p2298_p12 = scmp.lt.u32.totalorder %s2296_s14, %s2292_s22  ;;  %p2300_p13 = scmp.lt.u32.totalorder %s2292_s22, %s2818_s18 }
 0xc67   : > { %p2294_p2 = pnand %p2293_p4, %p2585_p10 }
 0xc68   : > { %p2299_p11 = por %p2298_p12, %p2297_p1 }
 0xc69   : > { %p2295_p8 = pneg %p2294_p2 }
 0xc6a   : > { %p2301_p6 = por %p2300_p13, %p2299_p11 }
 0xc6c   : > { %p2302_p3 = pnand %p2301_p6, %p2295_p8 }
 0xc6e   : > { %2305 = shalt.err (!%p2302_p3)
}
 0xc6f   : > { %2072 = dma.vmem_to_hbm [thread:$0]  (%p2585_p10), %s2820_s25, 16, %s2818_s18, %s1289_s21  }
 0xc70 PF: > { %s2906_s24 = sld [smem:[#allocation15_spill]]  ;;  %s2907_s27 = sld [smem:[#allocation17_spill]] }
 0xc71   : > { %p2909_p7 = scmp.ge.s32.totalorder %s2368_s10, 2 }
 0xc76   : > { %s1313_s7 = sand.u32 1, %s2906_s24   ;;  %p2908_p5 = scmp.ne.s32.totalorder %s2907_s27, 0 }
 0xc77   : > { %s1314_s16 = scalar_lea.sflag [#allocation4], %s1313_s7 }
 0xc78   : > { %p2089_p9 = pnand %p2909_p7, %p2908_p5 }
 0xc7a   : > { %2343 = dma.done.wait (!%p2089_p9), %s1314_s16, 16  }
 0xc7b   : > { %2345 = vsyncadd (!%p2089_p9), %s1314_s16, 4294967280  ;;  %s26_s10 = sadd.s32 1, %s2368_s10   ;;  %s2910_s27 = smov %s2352_s28 }
 0xc7c   : > { %p23_p0 = scmp.ge.s32.totalorder %s26_s10, 4   ;;  %s2911_s28 = smov %s2356_s29 }
 0xc7d   : > { %s2912_s29 = smov %s2597_s11  ;;  %s2913_s30 = smov %s2364_s9 }
 0xc7e   : > { %s2914_s9 = smov %s2916_s20  ;;  %25 = sbr.rel (!%p23_p0) target bundleno = 11 (0xb), region = 134 }
 0xc85   :  { %1318 = vsyncpa [#allocation3], 1 }
 0xc86   :  { %1320 = vsyncpa [#allocation3 + $0x1], 1 }
 0xc87   :  { %1321 = vsyncpa [#allocation6], 1 }
 0xc88   :  { %1322 = vsyncpa [#allocation9], 1 }
 0xc89   :  { %1323 = vsyncpa [#allocation4], 1 }
 0xc8a   :  { %1325 = vsyncpa [#allocation4 + $0x1], 1 }

</bundles_post_ra>
